<compile_context>
chip_gen: v5e
topology: v5e:2x2
jax: 0.10.0
libtpu: 0.0.40
codegen_flags: <defaults>
</compile_context>

<pallas_src>
import functools

import jax
import jax.numpy as jnp
from jax.experimental import pallas as pl
from jax.experimental.pallas import tpu as pltpu


# Weight-streaming tile targets (multiples of 128).  2048x2048 bf16 = 8 MiB
# per weight tile, 16 MiB double-buffered: large enough that the ~0.35 us
# per-grid-step overhead is negligible vs. the tile DMA on every generation,
# small enough to leave headroom inside v7x's 64 MiB/TC VMEM.
# TODO(synk): per-generation tuning (v6e/v5e can take full-K 16-32 MiB tiles).
_TK = 2048                       # reduction (K) tile target
_TN = 2048                       # output-feature (N) / tag tile target
_SUBLANE = 16                    # batch / channel padding (bf16 sublane pack)
_VMEM_LIMIT = 48 * 1024 * 1024   # explicit scoped-VMEM budget (v7x-safe)
_WEIGHT_DTYPE = jnp.bfloat16     # stream weights at half the HBM bytes
_ACT_DTYPE = jnp.bfloat16        # activations between layers


def _round_up(x, m):
    return ((x + m - 1) // m) * m


def _pick_tile(dim_p, target):
    """Largest multiple of 128 <= target that divides the 128-padded dim."""
    t = max(min(_round_up(target, 128), dim_p), 128)
    while dim_p % t:
        t -= 128
    return t


def _pad2d(a, rows, cols):
    pr, pc = rows - a.shape[0], cols - a.shape[1]
    if pr or pc:
        a = jnp.pad(a, ((0, pr), (0, pc)))
    return a


# ---------------------------------------------------------------------------
# Kernel 1: backbone stand-in.
#   img_ref : (Bp, Cp, H*W) f32, resident   -> global average pool -> (Bp, Cp)
#   o_ref   : relu(pooled @ W_bb_tile + b_bb_tile)  per feat_dim tile
# Grid = (feat_tiles,), "parallel".  The pool is recomputed per tile (cheap,
# and keeps the kernel correct under megacore sharding); the bf16 weight tile
# is the only thing streamed per step.
# ---------------------------------------------------------------------------
def backbone_kernel(img_ref, w_ref, b_ref, o_ref):
    pooled = jnp.mean(img_ref[...], axis=-1)                   # (Bp, Cp) f32
    y = jnp.dot(pooled.astype(w_ref.dtype), w_ref[...],
                preferred_element_type=jnp.float32) + b_ref[...]
    o_ref[...] = jnp.maximum(y, 0.0).astype(o_ref.dtype)


def pallas_backbone(images, w, b, *, tn=_TN, out_dtype=_ACT_DTYPE):
    B, C, H, W = images.shape
    F = b.shape[-1]                       # true feat_dim (bias is unpadded)
    Bp = _round_up(B, _SUBLANE)
    Cp = _round_up(C, _SUBLANE)
    Fp = _round_up(F, 128)
    tn = _pick_tile(Fp, tn)

    x = images.reshape(B, C, H * W).astype(jnp.float32)
    x = jnp.pad(x, ((0, Bp - B), (0, Cp - C), (0, 0)))          # zero channels
    wp = _pad2d(w.astype(_WEIGHT_DTYPE), Cp, Fp)                # no-op if prepped
    bp = _pad2d(b.reshape(1, -1).astype(jnp.float32), 1, Fp)

    return pl.pallas_call(
        backbone_kernel,
        out_shape=jax.ShapeDtypeStruct((Bp, Fp), out_dtype),
        grid_spec=pltpu.PrefetchScalarGridSpec(
            num_scalar_prefetch=0,
            grid=(Fp // tn,),
            in_specs=[
                pl.BlockSpec((Bp, Cp, H * W), lambda j: (0, 0, 0)),
                pl.BlockSpec((Cp, tn), lambda j: (0, j)),
                pl.BlockSpec((1, tn), lambda j: (0, j)),
            ],
            out_specs=pl.BlockSpec((Bp, tn), lambda j: (0, j)),
        ),
        compiler_params=pltpu.CompilerParams(
            dimension_semantics=("parallel",),
            vmem_limit_bytes=_VMEM_LIMIT),
    )(x, wp, bp)                                                # padded (Bp, Fp)


# ---------------------------------------------------------------------------
# Kernel 2: tiled linear  out = relu?(x @ W + b).
# Grid = (N_tiles, K_tiles): N first & "parallel" (megacore), K last &
# "arbitrary" (reduction into an f32 VMEM accumulator).  The bf16 activation
# stays resident (constant index_map); only the bf16 weight tile streams per
# step; the bias block is k-invariant (fetched once per N tile).
# ---------------------------------------------------------------------------
def linear_kernel(x_ref, w_ref, b_ref, o_ref, acc_ref, *, tk, apply_relu):
    k = pl.program_id(1)

    @pl.when(k == 0)
    def _():
        acc_ref[...] = jnp.zeros_like(acc_ref)

    xk = x_ref[:, pl.ds(pl.multiple_of(k * tk, 128), tk)]       # (Bp, tk) bf16
    acc_ref[...] += jnp.dot(xk, w_ref[...],
                            preferred_element_type=jnp.float32)

    @pl.when(k == pl.num_programs(1) - 1)
    def _():
        out = acc_ref[...] + b_ref[...]
        if apply_relu:
            out = jnp.maximum(out, 0.0)
        o_ref[...] = out.astype(o_ref.dtype)


def pallas_linear(x, w, b, *, apply_relu, out_dtype=_ACT_DTYPE, tk=_TK, tn=_TN):
    """`x` may be raw or already padded/bf16; `w` may be raw f32 or the
    bf16 / 128-padded version produced by prepare_params().  The true N comes
    from the (unpadded) bias; padded K columns of x are zero so they are
    harmless.  Returns the PADDED (Bp, Np) activation."""
    B, K = x.shape
    N = b.shape[-1]
    Bp = _round_up(B, _SUBLANE)
    Kp = _round_up(K, 128)
    Np = _round_up(N, 128)
    tk = _pick_tile(Kp, tk)
    tn = _pick_tile(Np, tn)

    xp = _pad2d(x.astype(_ACT_DTYPE), Bp, Kp)
    wp = _pad2d(w.astype(_WEIGHT_DTYPE), Kp, Np)                # no-op if prepped
    bp = _pad2d(b.reshape(1, -1).astype(jnp.float32), 1, Np)

    return pl.pallas_call(
        functools.partial(linear_kernel, tk=tk, apply_relu=apply_relu),
        out_shape=jax.ShapeDtypeStruct((Bp, Np), out_dtype),
        grid_spec=pltpu.PrefetchScalarGridSpec(
            num_scalar_prefetch=0,
            grid=(Np // tn, Kp // tk),
            in_specs=[
                pl.BlockSpec((Bp, Kp), lambda j, k: (0, 0)),    # resident acts
                pl.BlockSpec((tk, tn), lambda j, k: (k, j)),    # streamed weights
                pl.BlockSpec((1, tn), lambda j, k: (0, j)),
            ],
            out_specs=pl.BlockSpec((Bp, tn), lambda j, k: (0, j)),
            scratch_shapes=[pltpu.VMEM((Bp, tn), jnp.float32)],
        ),
        compiler_params=pltpu.CompilerParams(
            dimension_semantics=("parallel", "arbitrary"),
            vmem_limit_bytes=_VMEM_LIMIT),
    )(xp, wp, bp)                                               # padded (Bp, Np)


# ---------------------------------------------------------------------------
# Kernel 3: fused tail = fc3 (H2 -> out_dim) + logits (out_feats @ embed.T).
# Grid = (tag_tiles "parallel", K_tiles "arbitrary").  For each tag tile the
# fc3 accumulator is (re)built over K (B is tiny, so the redundant recompute
# per tag tile is negligible); on the last K step the bias is added, the
# feats slab for that tag tile is written (each tile owns its own slab -> no
# cross-core conflicts under megacore), and the logits tile is computed
# against the pre-transposed, padded bf16 embedding with a plain jnp.dot.
# ---------------------------------------------------------------------------
def tail_kernel(h_ref, w3_ref, b3_ref, embt_ref, feat_ref, logit_ref, acc_ref,
                *, tk):
    k = pl.program_id(1)

    @pl.when(k == 0)
    def _():
        acc_ref[...] = jnp.zeros_like(acc_ref)

    hk = h_ref[:, pl.ds(pl.multiple_of(k * tk, 128), tk)]       # (Bp, tk) bf16
    acc_ref[...] += jnp.dot(hk, w3_ref[...],
                            preferred_element_type=jnp.float32)

    @pl.when(k == pl.num_programs(1) - 1)
    def _():
        feats = acc_ref[...] + b3_ref[...]                      # (Bp, Dp) f32
        feat_ref[...] = feats.astype(feat_ref.dtype)
        logit_ref[...] = jnp.dot(
            feats.astype(embt_ref.dtype), embt_ref[...],
            preferred_element_type=jnp.float32).astype(logit_ref.dtype)


def pallas_fc3_logits(h, w3, b3, embed_t, *, tk=_TK, tt=_TN):
    """`embed_t` must be the (out_dim_p, num_tags_p) bf16 pre-transposed table
    (see prepare_params / _prep_embed).  Returns padded (Bp, Dp) feats and
    (Bp, Tp) logits."""
    B, K = h.shape
    D = b3.shape[-1]                      # true out_dim (e.g. 300)
    Dp = _round_up(D, 128)
    Tp = embed_t.shape[1]                 # already 128-padded
    Bp = _round_up(B, _SUBLANE)
    Kp = _round_up(K, 128)
    tk = _pick_tile(Kp, tk)
    tt = _pick_tile(Tp, tt)

    hp = _pad2d(h.astype(_ACT_DTYPE), Bp, Kp)
    w3p = _pad2d(w3.astype(_WEIGHT_DTYPE), Kp, Dp)              # no-op if prepped
    b3p = _pad2d(b3.reshape(1, -1).astype(jnp.float32), 1, Dp)

    n_t, n_k = Tp // tt, Kp // tk
    feats, logits = pl.pallas_call(
        functools.partial(tail_kernel, tk=tk),
        out_shape=(jax.ShapeDtypeStruct((n_t, Bp, Dp), jnp.float32),
                   jax.ShapeDtypeStruct((Bp, Tp), jnp.float32)),
        grid_spec=pltpu.PrefetchScalarGridSpec(
            num_scalar_prefetch=0,
            grid=(n_t, n_k),
            in_specs=[
                pl.BlockSpec((Bp, Kp), lambda t, k: (0, 0)),    # resident acts
                pl.BlockSpec((tk, Dp), lambda t, k: (k, 0)),    # fc3 weights
                pl.BlockSpec((1, Dp), lambda t, k: (0, 0)),
                pl.BlockSpec((Dp, tt), lambda t, k: (0, t)),    # embed.T tile
            ],
            out_specs=(pl.BlockSpec((None, Bp, Dp), lambda t, k: (t, 0, 0)),
                       pl.BlockSpec((Bp, tt), lambda t, k: (0, t))),
            scratch_shapes=[pltpu.VMEM((Bp, Dp), jnp.float32)],
        ),
        compiler_params=pltpu.CompilerParams(
            dimension_semantics=("parallel", "arbitrary"),
            vmem_limit_bytes=_VMEM_LIMIT),
    )(hp, w3p, b3p, embed_t)
    return feats[0], logits                                     # padded


# ---------------------------------------------------------------------------
# One-time (model-load) weight prep: cast matmul weights to bf16 and zero-pad
# every dim to a multiple of 128 (channels/batch to 16).  Tiles are always
# picked as divisors of the 128-padded dims, so this can never get out of
# sync with the kernels.  embed is padded, cast and pre-transposed once so
# the tail uses a canonical-layout matmul.  Idempotent; the forward also
# accepts raw f32 params.
# ---------------------------------------------------------------------------
def _prep_embed(embed):
    T, D = embed.shape
    return _pad2d(embed.astype(_WEIGHT_DTYPE),
                  _round_up(T, 128), _round_up(D, 128)).T       # (Dp, Tp)


def prepare_params(params, embed=None):
    p = dict(params)
    C, F = params["bb_w"].shape
    p["bb_w"] = _pad2d(params["bb_w"].astype(_WEIGHT_DTYPE),
                       _round_up(C, _SUBLANE), _round_up(F, 128))
    for name in ("fc1_w", "fc2_w", "fc3_w"):
        K, N = params[name].shape
        p[name] = _pad2d(params[name].astype(_WEIGHT_DTYPE),
                         _round_up(K, 128), _round_up(N, 128))
    if embed is not None:
        p["embed_t"] = _prep_embed(embed)
    return p


# ---------------------------------------------------------------------------
# Fast0Tag forward.  Activations flow between kernels in padded bf16 form;
# only the final outputs are sliced back to the true (B, out_dim/num_tags).
# ---------------------------------------------------------------------------
def fast0tag_forward(images, embed, params):
    B = images.shape[0]
    out_dim = params["fc3_b"].shape[-1]
    num_tags = embed.shape[0]

    feats = pallas_backbone(images, params["bb_w"], params["bb_b"])
    h1 = pallas_linear(feats, params["fc1_w"], params["fc1_b"], apply_relu=True)
    h2 = pallas_linear(h1, params["fc2_w"], params["fc2_b"], apply_relu=True)
    # Dropout(0.3): eval-mode identity (see TODO at top).
    embed_t = params["embed_t"] if "embed_t" in params else _prep_embed(embed)
    out_feats_p, logits_p = pallas_fc3_logits(h2, params["fc3_w"],
                                              params["fc3_b"], embed_t)
    return out_feats_p[:B, :out_dim], logits_p[:B, :num_tags]


# Pure-JAX reference mirroring the kernels' compute precision
# (bf16 weights/activations into the MXU, f32 accumulation).
def fast0tag_reference(images, embed, params):
    def lin(x, w, b, relu):
        y = jnp.dot(x.astype(jnp.bfloat16), w.astype(jnp.bfloat16),
                    preferred_element_type=jnp.float32) + b
        return jnp.maximum(y, 0.0) if relu else y

    B, C, H, W = images.shape
    pooled = jnp.mean(images.reshape(B, C, H * W), axis=-1)
    feats = lin(pooled, params["bb_w"], params["bb_b"], True)
    h1 = lin(feats, params["fc1_w"], params["fc1_b"], True)
    h2 = lin(h1, params["fc2_w"], params["fc2_b"], True)
    out_feats = lin(h2, params["fc3_w"], params["fc3_b"], False)
    logits = jax.lax.dot_general(
        out_feats.astype(jnp.bfloat16), embed.astype(jnp.bfloat16),
        dimension_numbers=(((1,), (1,)), ((), ())),
        preferred_element_type=jnp.float32)
    return out_feats, logits


if __name__ == "__main__":
    # Small proxy dims (module's real dims: feat_dim=2048, hidden=8096/2048,
    # out_dim=300).  out_dim is kept at the real 300 and H1 / NUM_TAGS are
    # deliberately NOT multiples of 128 to exercise the padded tile grid.
    B, C, H, W = 8, 4, 16, 16
    FEAT_DIM, H1, H2, OUT_DIM, NUM_TAGS = 256, 500, 256, 300, 200

    key = jax.random.PRNGKey(0)
    keys = jax.random.split(key, 10)

    def winit(k, shape):
        return jax.random.normal(k, shape, jnp.float32) / jnp.sqrt(shape[0])

    params = {
        "bb_w":  winit(keys[0], (C, FEAT_DIM)),
        "bb_b":  0.1 * jax.random.normal(keys[1], (1, FEAT_DIM), jnp.float32),
        "fc1_w": winit(keys[2], (FEAT_DIM, H1)),
        "fc1_b": 0.1 * jax.random.normal(keys[3], (1, H1), jnp.float32),
        "fc2_w": winit(keys[4], (H1, H2)),
        "fc2_b": 0.1 * jax.random.normal(keys[5], (1, H2), jnp.float32),
        "fc3_w": winit(keys[6], (H2, OUT_DIM)),
        "fc3_b": 0.1 * jax.random.normal(keys[7], (1, OUT_DIM), jnp.float32),
    }
    images = jax.random.normal(keys[8], (B, C, H, W), jnp.float32)   # NCHW
    embed = jax.random.normal(keys[9], (NUM_TAGS, OUT_DIM), jnp.float32)

    # One-time weight preprocessing (bf16 cast + 128-pad + embed transpose).
    prepped = prepare_params(params, embed=embed)

    out_feats, logits = jax.jit(fast0tag_forward)(images, embed, prepped)
    jax.block_until_ready((out_feats, logits))

    ref_feats, ref_logits = fast0tag_reference(images, embed, params)
    assert out_feats.shape == (B, OUT_DIM) and logits.shape == (B, NUM_TAGS)
    assert jnp.allclose(out_feats, ref_feats, rtol=5e-3, atol=5e-3), (
        float(jnp.max(jnp.abs(out_feats - ref_feats))))
    assert jnp.allclose(logits, ref_logits, rtol=5e-3, atol=5e-3), (
        float(jnp.max(jnp.abs(logits - ref_logits))))

    print("KERNEL_OK")
</pallas_src>

<mosaic_0001>
module attributes {stable_mosaic.version = 11 : i64} {
  func.func @backbone_kernel(%arg0: i32, %arg1: memref<16x16x256xf32, #tpu.memory_space<vmem>>, %arg2: memref<16x256xbf16, #tpu.memory_space<vmem>>, %arg3: memref<1x256xf32, #tpu.memory_space<vmem>>, %arg4: memref<16x256xbf16, #tpu.memory_space<vmem>>) attributes {dimension_semantics = [#tpu.dimension_semantics<parallel>], iteration_bounds = array<i64: 1>, scalar_prefetch = 0 : i64, scratch_operands = 0 : i64, tpu.core_type = #tpu.core_type<tc>, window_params = [{pipeline_mode = #tpu.pipeline_mode<synchronous>, transform_indices = @transform_0, window_bounds = array<i64: 16, 16, 256>}, {transform_indices = @transform_1, window_bounds = array<i64: 16, 256>}, {transform_indices = @transform_2, window_bounds = array<i64: 1, 256>}, {transform_indices = @transform_3, window_bounds = array<i64: 16, 256>}]} {
    %c0 = arith.constant 0 : index
    %c0_0 = arith.constant 0 : index
    %c0_1 = arith.constant 0 : index
    %0 = vector.load %arg1[%c0, %c0_0, %c0_1] : memref<16x16x256xf32, #tpu.memory_space<vmem>>, vector<16x16x256xf32>
    %cst = arith.constant dense<0.000000e+00> : vector<16x16xf32>
    %1 = vector.multi_reduction <add>, %0, %cst [2] : vector<16x16x256xf32> to vector<16x16xf32>
    %cst_2 = arith.constant 2.560000e+02 : f32
    %2 = vector.broadcast %cst_2 : f32 to vector<16x16xf32>
    %3 = arith.divf %1, %2 : vector<16x16xf32>
    %4 = arith.truncf %3 : vector<16x16xf32> to vector<16x16xbf16>
    %c0_3 = arith.constant 0 : index
    %c0_4 = arith.constant 0 : index
    %5 = vector.load %arg2[%c0_3, %c0_4] : memref<16x256xbf16, #tpu.memory_space<vmem>>, vector<16x256xbf16>
    %cst_5 = arith.constant dense<0.000000e+00> : vector<16x256xf32>
    %6 = tpu.matmul %4, %5, %cst_5 {dimension_numbers = #tpu.dot_dimension_numbers<[1], [0], [0], [1], [0, 0, 1, 1], [], []>} : vector<16x16xbf16>, vector<16x256xbf16>, vector<16x256xf32> -> vector<16x256xf32>
    %c0_6 = arith.constant 0 : index
    %c0_7 = arith.constant 0 : index
    %7 = vector.load %arg3[%c0_6, %c0_7] : memref<1x256xf32, #tpu.memory_space<vmem>>, vector<1x256xf32>
    %8 = vector.broadcast %7 : vector<1x256xf32> to vector<16x256xf32>
    %9 = arith.addf %6, %8 : vector<16x256xf32>
    %cst_8 = arith.constant 0.000000e+00 : f32
    %10 = vector.broadcast %cst_8 : f32 to vector<16x256xf32>
    %11 = arith.maximumf %9, %10 : vector<16x256xf32>
    %12 = arith.truncf %11 : vector<16x256xf32> to vector<16x256xbf16>
    %c0_9 = arith.constant 0 : index
    %c0_10 = arith.constant 0 : index
    %13 = vector.load %arg4[%c0_9, %c0_10] : memref<16x256xbf16, #tpu.memory_space<vmem>>, vector<16x256xbf16>
    tpu.vector_store %arg4[%c0_9, %c0_10], %12 {strides = array<i32>} : memref<16x256xbf16, #tpu.memory_space<vmem>>, vector<16x256xbf16>,
    return
  }
  func.func @transform_0(%arg0: i32) -> (i32, i32, i32) {
    %c0_i32 = arith.constant 0 : i32
    %c0_i32_0 = arith.constant 0 : i32
    %c0_i32_1 = arith.constant 0 : i32
    %c0_i32_2 = arith.constant 0 : i32
    return %c0_i32, %c0_i32_0, %c0_i32_1 : i32, i32, i32
  }
  func.func @transform_1(%arg0: i32) -> (i32, i32) {
    %c0_i32 = arith.constant 0 : i32
    %c0_i32_0 = arith.constant 0 : i32
    return %c0_i32, %arg0 : i32, i32
  }
  func.func @transform_2(%arg0: i32) -> (i32, i32) {
    %c0_i32 = arith.constant 0 : i32
    %c0_i32_0 = arith.constant 0 : i32
    return %c0_i32, %arg0 : i32, i32
  }
  func.func @transform_3(%arg0: i32) -> (i32, i32) {
    %c0_i32 = arith.constant 0 : i32
    %c0_i32_0 = arith.constant 0 : i32
    return %c0_i32, %arg0 : i32, i32
  }
}

module attributes {stable_mosaic.version = 11 : i64} {
  func.func @linear_kernel(%arg0: i32, %arg1: i32, %arg2: memref<16x256xbf16, #tpu.memory_space<vmem>>, %arg3: memref<256x512xbf16, #tpu.memory_space<vmem>>, %arg4: memref<1x512xf32, #tpu.memory_space<vmem>>, %arg5: memref<16x512xbf16, #tpu.memory_space<vmem>>, %arg6: memref<16x512xf32, #tpu.memory_space<vmem>>) attributes {dimension_semantics = [#tpu.dimension_semantics<parallel>, #tpu.dimension_semantics<arbitrary>], iteration_bounds = array<i64: 1, 1>, scalar_prefetch = 0 : i64, scratch_operands = 1 : i64, tpu.core_type = #tpu.core_type<tc>, window_params = [{pipeline_mode = #tpu.pipeline_mode<synchronous>, transform_indices = @transform_0, window_bounds = array<i64: 16, 256>}, {transform_indices = @transform_1, window_bounds = array<i64: 256, 512>}, {transform_indices = @transform_2, window_bounds = array<i64: 1, 512>}, {transform_indices = @transform_3, window_bounds = array<i64: 16, 512>}]} {
    %c0_i32 = arith.constant 0 : i32
    %0 = arith.cmpi eq, %arg1, %c0_i32 : i32
    %1 = arith.extui %0 : i1 to i32
    %c0_i32_0 = arith.constant 0 : i32
    %2 = arith.cmpi ne, %1, %c0_i32_0 : i32
    scf.if %2 {
      %cst_9 = arith.constant 0.000000e+00 : f32
      %15 = vector.broadcast %cst_9 : f32 to vector<16x512xf32>
      %c0_10 = arith.constant 0 : index
      %c0_11 = arith.constant 0 : index
      %16 = vector.load %arg6[%c0_10, %c0_11] : memref<16x512xf32, #tpu.memory_space<vmem>>, vector<16x512xf32>
      tpu.vector_store %arg6[%c0_10, %c0_11], %15 {strides = array<i32>} : memref<16x512xf32, #tpu.memory_space<vmem>>, vector<16x512xf32>,
    } else {
    }
    %c256_i32 = arith.constant 256 : i32
    %3 = arith.muli %arg1, %c256_i32 : i32
    %4 = tpu.assume_multiple %3, 128 : i32
    %c0 = arith.constant 0 : index
    %5 = arith.index_cast %4 : i32 to index
    %6 = vector.load %arg2[%c0, %5] : memref<16x256xbf16, #tpu.memory_space<vmem>>, vector<16x256xbf16>
    %c0_1 = arith.constant 0 : index
    %c0_2 = arith.constant 0 : index
    %7 = vector.load %arg6[%c0_1, %c0_2] : memref<16x512xf32, #tpu.memory_space<vmem>>, vector<16x512xf32>
    %c0_3 = arith.constant 0 : index
    %c0_4 = arith.constant 0 : index
    %8 = vector.load %arg3[%c0_3, %c0_4] : memref<256x512xbf16, #tpu.memory_space<vmem>>, vector<256x512xbf16>
    %cst = arith.constant dense<0.000000e+00> : vector<16x512xf32>
    %9 = tpu.matmul %6, %8, %cst {dimension_numbers = #tpu.dot_dimension_numbers<[1], [0], [0], [1], [0, 0, 1, 1], [], []>} : vector<16x256xbf16>, vector<256x512xbf16>, vector<16x512xf32> -> vector<16x512xf32>
    %10 = arith.addf %7, %9 : vector<16x512xf32>
    %c0_5 = arith.constant 0 : index
    %c0_6 = arith.constant 0 : index
    %11 = vector.load %arg6[%c0_5, %c0_6] : memref<16x512xf32, #tpu.memory_space<vmem>>, vector<16x512xf32>
    tpu.vector_store %arg6[%c0_5, %c0_6], %10 {strides = array<i32>} : memref<16x512xf32, #tpu.memory_space<vmem>>, vector<16x512xf32>,
    %c0_i32_7 = arith.constant 0 : i32
    %12 = arith.cmpi eq, %arg1, %c0_i32_7 : i32
    %13 = arith.extui %12 : i1 to i32
    %c0_i32_8 = arith.constant 0 : i32
    %14 = arith.cmpi ne, %13, %c0_i32_8 : i32
    scf.if %14 {
      %c0_9 = arith.constant 0 : index
      %c0_10 = arith.constant 0 : index
      %15 = vector.load %arg6[%c0_9, %c0_10] : memref<16x512xf32, #tpu.memory_space<vmem>>, vector<16x512xf32>
      %c0_11 = arith.constant 0 : index
      %c0_12 = arith.constant 0 : index
      %16 = vector.load %arg4[%c0_11, %c0_12] : memref<1x512xf32, #tpu.memory_space<vmem>>, vector<1x512xf32>
      %17 = vector.broadcast %16 : vector<1x512xf32> to vector<16x512xf32>
      %18 = arith.addf %15, %17 : vector<16x512xf32>
      %cst_13 = arith.constant 0.000000e+00 : f32
      %19 = vector.broadcast %cst_13 : f32 to vector<16x512xf32>
      %20 = arith.maximumf %18, %19 : vector<16x512xf32>
      %21 = arith.truncf %20 : vector<16x512xf32> to vector<16x512xbf16>
      %c0_14 = arith.constant 0 : index
      %c0_15 = arith.constant 0 : index
      %22 = vector.load %arg5[%c0_14, %c0_15] : memref<16x512xbf16, #tpu.memory_space<vmem>>, vector<16x512xbf16>
      tpu.vector_store %arg5[%c0_14, %c0_15], %21 {strides = array<i32>} : memref<16x512xbf16, #tpu.memory_space<vmem>>, vector<16x512xbf16>,
    } else {
    }
    return
  }
  func.func @transform_0(%arg0: i32, %arg1: i32) -> (i32, i32) {
    %c0_i32 = arith.constant 0 : i32
    %c0_i32_0 = arith.constant 0 : i32
    %c0_i32_1 = arith.constant 0 : i32
    return %c0_i32, %c0_i32_0 : i32, i32
  }
  func.func @transform_1(%arg0: i32, %arg1: i32) -> (i32, i32) {
    %c0_i32 = arith.constant 0 : i32
    return %arg1, %arg0 : i32, i32
  }
  func.func @transform_2(%arg0: i32, %arg1: i32) -> (i32, i32) {
    %c0_i32 = arith.constant 0 : i32
    %c0_i32_0 = arith.constant 0 : i32
    return %c0_i32, %arg0 : i32, i32
  }
  func.func @transform_3(%arg0: i32, %arg1: i32) -> (i32, i32) {
    %c0_i32 = arith.constant 0 : i32
    %c0_i32_0 = arith.constant 0 : i32
    return %c0_i32, %arg0 : i32, i32
  }
}

module attributes {stable_mosaic.version = 11 : i64} {
  func.func @linear_kernel(%arg0: i32, %arg1: i32, %arg2: memref<16x512xbf16, #tpu.memory_space<vmem>>, %arg3: memref<512x256xbf16, #tpu.memory_space<vmem>>, %arg4: memref<1x256xf32, #tpu.memory_space<vmem>>, %arg5: memref<16x256xbf16, #tpu.memory_space<vmem>>, %arg6: memref<16x256xf32, #tpu.memory_space<vmem>>) attributes {dimension_semantics = [#tpu.dimension_semantics<parallel>, #tpu.dimension_semantics<arbitrary>], iteration_bounds = array<i64: 1, 1>, scalar_prefetch = 0 : i64, scratch_operands = 1 : i64, tpu.core_type = #tpu.core_type<tc>, window_params = [{pipeline_mode = #tpu.pipeline_mode<synchronous>, transform_indices = @transform_0, window_bounds = array<i64: 16, 512>}, {transform_indices = @transform_1, window_bounds = array<i64: 512, 256>}, {transform_indices = @transform_2, window_bounds = array<i64: 1, 256>}, {transform_indices = @transform_3, window_bounds = array<i64: 16, 256>}]} {
    %c0_i32 = arith.constant 0 : i32
    %0 = arith.cmpi eq, %arg1, %c0_i32 : i32
    %1 = arith.extui %0 : i1 to i32
    %c0_i32_0 = arith.constant 0 : i32
    %2 = arith.cmpi ne, %1, %c0_i32_0 : i32
    scf.if %2 {
      %cst_9 = arith.constant 0.000000e+00 : f32
      %15 = vector.broadcast %cst_9 : f32 to vector<16x256xf32>
      %c0_10 = arith.constant 0 : index
      %c0_11 = arith.constant 0 : index
      %16 = vector.load %arg6[%c0_10, %c0_11] : memref<16x256xf32, #tpu.memory_space<vmem>>, vector<16x256xf32>
      tpu.vector_store %arg6[%c0_10, %c0_11], %15 {strides = array<i32>} : memref<16x256xf32, #tpu.memory_space<vmem>>, vector<16x256xf32>,
    } else {
    }
    %c512_i32 = arith.constant 512 : i32
    %3 = arith.muli %arg1, %c512_i32 : i32
    %4 = tpu.assume_multiple %3, 128 : i32
    %c0 = arith.constant 0 : index
    %5 = arith.index_cast %4 : i32 to index
    %6 = vector.load %arg2[%c0, %5] : memref<16x512xbf16, #tpu.memory_space<vmem>>, vector<16x512xbf16>
    %c0_1 = arith.constant 0 : index
    %c0_2 = arith.constant 0 : index
    %7 = vector.load %arg6[%c0_1, %c0_2] : memref<16x256xf32, #tpu.memory_space<vmem>>, vector<16x256xf32>
    %c0_3 = arith.constant 0 : index
    %c0_4 = arith.constant 0 : index
    %8 = vector.load %arg3[%c0_3, %c0_4] : memref<512x256xbf16, #tpu.memory_space<vmem>>, vector<512x256xbf16>
    %cst = arith.constant dense<0.000000e+00> : vector<16x256xf32>
    %9 = tpu.matmul %6, %8, %cst {dimension_numbers = #tpu.dot_dimension_numbers<[1], [0], [0], [1], [0, 0, 1, 1], [], []>} : vector<16x512xbf16>, vector<512x256xbf16>, vector<16x256xf32> -> vector<16x256xf32>
    %10 = arith.addf %7, %9 : vector<16x256xf32>
    %c0_5 = arith.constant 0 : index
    %c0_6 = arith.constant 0 : index
    %11 = vector.load %arg6[%c0_5, %c0_6] : memref<16x256xf32, #tpu.memory_space<vmem>>, vector<16x256xf32>
    tpu.vector_store %arg6[%c0_5, %c0_6], %10 {strides = array<i32>} : memref<16x256xf32, #tpu.memory_space<vmem>>, vector<16x256xf32>,
    %c0_i32_7 = arith.constant 0 : i32
    %12 = arith.cmpi eq, %arg1, %c0_i32_7 : i32
    %13 = arith.extui %12 : i1 to i32
    %c0_i32_8 = arith.constant 0 : i32
    %14 = arith.cmpi ne, %13, %c0_i32_8 : i32
    scf.if %14 {
      %c0_9 = arith.constant 0 : index
      %c0_10 = arith.constant 0 : index
      %15 = vector.load %arg6[%c0_9, %c0_10] : memref<16x256xf32, #tpu.memory_space<vmem>>, vector<16x256xf32>
      %c0_11 = arith.constant 0 : index
      %c0_12 = arith.constant 0 : index
      %16 = vector.load %arg4[%c0_11, %c0_12] : memref<1x256xf32, #tpu.memory_space<vmem>>, vector<1x256xf32>
      %17 = vector.broadcast %16 : vector<1x256xf32> to vector<16x256xf32>
      %18 = arith.addf %15, %17 : vector<16x256xf32>
      %cst_13 = arith.constant 0.000000e+00 : f32
      %19 = vector.broadcast %cst_13 : f32 to vector<16x256xf32>
      %20 = arith.maximumf %18, %19 : vector<16x256xf32>
      %21 = arith.truncf %20 : vector<16x256xf32> to vector<16x256xbf16>
      %c0_14 = arith.constant 0 : index
      %c0_15 = arith.constant 0 : index
      %22 = vector.load %arg5[%c0_14, %c0_15] : memref<16x256xbf16, #tpu.memory_space<vmem>>, vector<16x256xbf16>
      tpu.vector_store %arg5[%c0_14, %c0_15], %21 {strides = array<i32>} : memref<16x256xbf16, #tpu.memory_space<vmem>>, vector<16x256xbf16>,
    } else {
    }
    return
  }
  func.func @transform_0(%arg0: i32, %arg1: i32) -> (i32, i32) {
    %c0_i32 = arith.constant 0 : i32
    %c0_i32_0 = arith.constant 0 : i32
    %c0_i32_1 = arith.constant 0 : i32
    return %c0_i32, %c0_i32_0 : i32, i32
  }
  func.func @transform_1(%arg0: i32, %arg1: i32) -> (i32, i32) {
    %c0_i32 = arith.constant 0 : i32
    return %arg1, %arg0 : i32, i32
  }
  func.func @transform_2(%arg0: i32, %arg1: i32) -> (i32, i32) {
    %c0_i32 = arith.constant 0 : i32
    %c0_i32_0 = arith.constant 0 : i32
    return %c0_i32, %arg0 : i32, i32
  }
  func.func @transform_3(%arg0: i32, %arg1: i32) -> (i32, i32) {
    %c0_i32 = arith.constant 0 : i32
    %c0_i32_0 = arith.constant 0 : i32
    return %c0_i32, %arg0 : i32, i32
  }
}

module attributes {stable_mosaic.version = 11 : i64} {
  func.func @tail_kernel(%arg0: i32, %arg1: i32, %arg2: memref<16x256xbf16, #tpu.memory_space<vmem>>, %arg3: memref<256x384xbf16, #tpu.memory_space<vmem>>, %arg4: memref<1x384xf32, #tpu.memory_space<vmem>>, %arg5: memref<384x256xbf16, #tpu.memory_space<vmem>>, %arg6: memref<1x16x384xf32, #tpu.memory_space<vmem>>, %arg7: memref<16x256xf32, #tpu.memory_space<vmem>>, %arg8: memref<16x384xf32, #tpu.memory_space<vmem>>) attributes {dimension_semantics = [#tpu.dimension_semantics<parallel>, #tpu.dimension_semantics<arbitrary>], iteration_bounds = array<i64: 1, 1>, scalar_prefetch = 0 : i64, scratch_operands = 1 : i64, tpu.core_type = #tpu.core_type<tc>, window_params = [{pipeline_mode = #tpu.pipeline_mode<synchronous>, transform_indices = @transform_0, window_bounds = array<i64: 16, 256>}, {transform_indices = @transform_1, window_bounds = array<i64: 256, 384>}, {pipeline_mode = #tpu.pipeline_mode<synchronous>, transform_indices = @transform_2, window_bounds = array<i64: 1, 384>}, {transform_indices = @transform_3, window_bounds = array<i64: 384, 256>}, {transform_indices = @transform_4, window_bounds = array<i64: 1, 16, 384>}, {transform_indices = @transform_5, window_bounds = array<i64: 16, 256>}]} {
    %c0_i32 = arith.constant 0 : i32
    %0 = arith.cmpi eq, %arg1, %c0_i32 : i32
    %1 = arith.extui %0 : i1 to i32
    %c0_i32_0 = arith.constant 0 : i32
    %2 = arith.cmpi ne, %1, %c0_i32_0 : i32
    scf.if %2 {
      %cst_9 = arith.constant 0.000000e+00 : f32
      %15 = vector.broadcast %cst_9 : f32 to vector<16x384xf32>
      %c0_10 = arith.constant 0 : index
      %c0_11 = arith.constant 0 : index
      %16 = vector.load %arg8[%c0_10, %c0_11] : memref<16x384xf32, #tpu.memory_space<vmem>>, vector<16x384xf32>
      tpu.vector_store %arg8[%c0_10, %c0_11], %15 {strides = array<i32>} : memref<16x384xf32, #tpu.memory_space<vmem>>, vector<16x384xf32>,
    } else {
    }
    %c256_i32 = arith.constant 256 : i32
    %3 = arith.muli %arg1, %c256_i32 : i32
    %4 = tpu.assume_multiple %3, 128 : i32
    %c0 = arith.constant 0 : index
    %5 = arith.index_cast %4 : i32 to index
    %6 = vector.load %arg2[%c0, %5] : memref<16x256xbf16, #tpu.memory_space<vmem>>, vector<16x256xbf16>
    %c0_1 = arith.constant 0 : index
    %c0_2 = arith.constant 0 : index
    %7 = vector.load %arg8[%c0_1, %c0_2] : memref<16x384xf32, #tpu.memory_space<vmem>>, vector<16x384xf32>
    %c0_3 = arith.constant 0 : index
    %c0_4 = arith.constant 0 : index
    %8 = vector.load %arg3[%c0_3, %c0_4] : memref<256x384xbf16, #tpu.memory_space<vmem>>, vector<256x384xbf16>
    %cst = arith.constant dense<0.000000e+00> : vector<16x384xf32>
    %9 = tpu.matmul %6, %8, %cst {dimension_numbers = #tpu.dot_dimension_numbers<[1], [0], [0], [1], [0, 0, 1, 1], [], []>} : vector<16x256xbf16>, vector<256x384xbf16>, vector<16x384xf32> -> vector<16x384xf32>
    %10 = arith.addf %7, %9 : vector<16x384xf32>
    %c0_5 = arith.constant 0 : index
    %c0_6 = arith.constant 0 : index
    %11 = vector.load %arg8[%c0_5, %c0_6] : memref<16x384xf32, #tpu.memory_space<vmem>>, vector<16x384xf32>
    tpu.vector_store %arg8[%c0_5, %c0_6], %10 {strides = array<i32>} : memref<16x384xf32, #tpu.memory_space<vmem>>, vector<16x384xf32>,
    %c0_i32_7 = arith.constant 0 : i32
    %12 = arith.cmpi eq, %arg1, %c0_i32_7 : i32
    %13 = arith.extui %12 : i1 to i32
    %c0_i32_8 = arith.constant 0 : i32
    %14 = arith.cmpi ne, %13, %c0_i32_8 : i32
    scf.if %14 {
      %c0_9 = arith.constant 0 : index
      %c0_10 = arith.constant 0 : index
      %15 = vector.load %arg8[%c0_9, %c0_10] : memref<16x384xf32, #tpu.memory_space<vmem>>, vector<16x384xf32>
      %c0_11 = arith.constant 0 : index
      %c0_12 = arith.constant 0 : index
      %16 = vector.load %arg4[%c0_11, %c0_12] : memref<1x384xf32, #tpu.memory_space<vmem>>, vector<1x384xf32>
      %17 = vector.broadcast %16 : vector<1x384xf32> to vector<16x384xf32>
      %18 = arith.addf %15, %17 : vector<16x384xf32>
      %c0_13 = arith.constant 0 : index
      %c0_14 = arith.constant 0 : index
      %c0_15 = arith.constant 0 : index
      %19 = vector.load %arg6[%c0_13, %c0_14, %c0_15] : memref<1x16x384xf32, #tpu.memory_space<vmem>>, vector<1x16x384xf32>
      %20 = vector.shape_cast %19 : vector<1x16x384xf32> to vector<16x384xf32>
      %21 = vector.shape_cast %18 : vector<16x384xf32> to vector<1x16x384xf32>
      tpu.vector_store %arg6[%c0_13, %c0_14, %c0_15], %21 {strides = array<i32>} : memref<1x16x384xf32, #tpu.memory_space<vmem>>, vector<1x16x384xf32>,
      %22 = arith.truncf %18 : vector<16x384xf32> to vector<16x384xbf16>
      %c0_16 = arith.constant 0 : index
      %c0_17 = arith.constant 0 : index
      %23 = vector.load %arg5[%c0_16, %c0_17] : memref<384x256xbf16, #tpu.memory_space<vmem>>, vector<384x256xbf16>
      %cst_18 = arith.constant dense<0.000000e+00> : vector<16x256xf32>
      %24 = tpu.matmul %22, %23, %cst_18 {dimension_numbers = #tpu.dot_dimension_numbers<[1], [0], [0], [1], [0, 0, 1, 1], [], []>} : vector<16x384xbf16>, vector<384x256xbf16>, vector<16x256xf32> -> vector<16x256xf32>
      %c0_19 = arith.constant 0 : index
      %c0_20 = arith.constant 0 : index
      %25 = vector.load %arg7[%c0_19, %c0_20] : memref<16x256xf32, #tpu.memory_space<vmem>>, vector<16x256xf32>
      tpu.vector_store %arg7[%c0_19, %c0_20], %24 {strides = array<i32>} : memref<16x256xf32, #tpu.memory_space<vmem>>, vector<16x256xf32>,
    } else {
    }
    return
  }
  func.func @transform_0(%arg0: i32, %arg1: i32) -> (i32, i32) {
    %c0_i32 = arith.constant 0 : i32
    %c0_i32_0 = arith.constant 0 : i32
    %c0_i32_1 = arith.constant 0 : i32
    return %c0_i32, %c0_i32_0 : i32, i32
  }
  func.func @transform_1(%arg0: i32, %arg1: i32) -> (i32, i32) {
    %c0_i32 = arith.constant 0 : i32
    %c0_i32_0 = arith.constant 0 : i32
    return %arg1, %c0_i32 : i32, i32
  }
  func.func @transform_2(%arg0: i32, %arg1: i32) -> (i32, i32) {
    %c0_i32 = arith.constant 0 : i32
    %c0_i32_0 = arith.constant 0 : i32
    %c0_i32_1 = arith.constant 0 : i32
    return %c0_i32, %c0_i32_0 : i32, i32
  }
  func.func @transform_3(%arg0: i32, %arg1: i32) -> (i32, i32) {
    %c0_i32 = arith.constant 0 : i32
    %c0_i32_0 = arith.constant 0 : i32
    return %c0_i32, %arg0 : i32, i32
  }
  func.func @transform_4(%arg0: i32, %arg1: i32) -> (i32, i32, i32) {
    %c0_i32 = arith.constant 0 : i32
    %c0_i32_0 = arith.constant 0 : i32
    %c0_i32_1 = arith.constant 0 : i32
    return %arg0, %c0_i32, %c0_i32_0 : i32, i32, i32
  }
  func.func @transform_5(%arg0: i32, %arg1: i32) -> (i32, i32) {
    %c0_i32 = arith.constant 0 : i32
    %c0_i32_0 = arith.constant 0 : i32
    return %c0_i32, %arg0 : i32, i32
  }
}

</mosaic_0001>

<bundles_post_ra>
// kernel: fast0tag_forward.4
= control target key start
LH: loop header
LB: loop body
LE: loop exit
PB: predicated region body
PF: predicated region fallthrough
CT: control target
= control target key end

     0   :  { %vm291_vm1 = vcmask 130112   ;;  %vm338_vm2 = vcmask 1041409   ;;  %vm340_vm3 = vcmask 1042434   ;;  %vm342_vm4 = vcmask 1043459   ;;  %s768_s0 = inlined_call_operand.vmem [shape: f32[16,16,256], index: 0, kind: input, shape index: {}]   ;;  %s769_s1 = inlined_call_operand.vmem [shape: bf16[16,256], index: 1, kind: input, shape index: {}]   ;;  %s770_s2 = inlined_call_operand.vmem [shape: f32[1,256], index: 2, kind: input, shape index: {}]   ;;  %s771_s3 = inlined_call_operand.vmem [shape: bf16[16,256], index: 3, kind: output, shape index: {}]  }
   0x1   :  { %v47_v0 = vld [vmem:[%s768_s0 + $0x100] sm:$0xff]  ;;  %v48_v1 = vld [vmem:[%s768_s0 + $0x108] sm:$0xff]  ;;  %v49_v9 = vld [vmem:[%s768_s0 + $0x110] sm:$0xff]  ;;  %vm344_vm5 = vcmask 1044484   ;;  %vm346_vm6 = vcmask 1045509   ;;  %vm348_vm7 = vcmask 1046534  }
   0x2   :  { %v19_v2 = vld [vmem:[%s768_s0 + $0x20] sm:$0xff]  ;;  %v127_v3 = vadd.f32 %v48_v1, %v47_v0  ;;  %v20_v4 = vld [vmem:[%s768_s0 + $0x28] sm:$0xff]  ;;  %v50_v10 = vld [vmem:[%s768_s0 + $0x118] sm:$0xff]  ;;  %vm350_vm8 = vcmask 1047559   ;;  %vm370_vm9 = vcmask 130048  }
   0x3   :  { %v15_v5 = vld [vmem:[%s768_s0] sm:$0xff]  ;;  %v16_v6 = vld [vmem:[%s768_s0 + $0x8] sm:$0xff]  ;;  %v85_v7 = vadd.f32 %v20_v4, %v19_v2  ;;  %v21_v11 = vld [vmem:[%s768_s0 + $0x30] sm:$0xff]  ;;  %v130_v15 = vadd.f32 %v50_v10, %v49_v9 }
   0x4   :  { %v79_v8 = vadd.f32 %v16_v6, %v15_v5  ;;  %128 = vadd.xlane.f32.xlu2 %v127_v3  ;;  %v22_v12 = vld [vmem:[%s768_s0 + $0x38] sm:$0xff]  ;;  %v17_v13 = vld [vmem:[%s768_s0 + $0x10] sm:$0xff]  ;;  %v23_v18 = vld [vmem:[%s768_s0 + $0x40] sm:$0xff] }
   0x5   :  { %86 = vadd.xlane.f32.xlu1 %v85_v7  ;;  %v18_v14 = vld [vmem:[%s768_s0 + $0x18] sm:$0xff]  ;;  %v88_v16 = vadd.f32 %v22_v12, %v21_v11  ;;  %v24_v19 = vld [vmem:[%s768_s0 + $0x48] sm:$0xff]  ;;  %v53_v20 = vld [vmem:[%s768_s0 + $0x130] sm:$0xff] }
   0x6   :  { %80 = vadd.xlane.f32.xlu0 %v79_v8  ;;  %v82_v17 = vadd.f32 %v18_v14, %v17_v13  ;;  %v54_v21 = vld [vmem:[%s768_s0 + $0x138] sm:$0xff]  ;;  %v51_v22 = vld [vmem:[%s768_s0 + $0x120] sm:$0xff]  ;;  %v52_v23 = vld [vmem:[%s768_s0 + $0x128] sm:$0xff]  ;;  %v91_v24 = vadd.f32 %v24_v19, %v23_v18 }
   0x7   :  { %v136_v25 = vadd.f32 %v54_v21, %v53_v20  ;;  %v133_v26 = vadd.f32 %v52_v23, %v51_v22  ;;  %v57_v27 = vld [vmem:[%s768_s0 + $0x150] sm:$0xff]  ;;  %v58_v28 = vld [vmem:[%s768_s0 + $0x158] sm:$0xff]  ;;  %v55_v29 = vld [vmem:[%s768_s0 + $0x140] sm:$0xff] }
   0x8   :  { %v56_v30 = vld [vmem:[%s768_s0 + $0x148] sm:$0xff]  ;;  %v25_v31 = vld [vmem:[%s768_s0 + $0x50] sm:$0xff]  ;;  %v26_v32 = vld [vmem:[%s768_s0 + $0x58] sm:$0xff]  ;;  %v142_v33 = vadd.f32 %v58_v28, %v57_v27 }
   0x9   :  { %v139_v34 = vadd.f32 %v56_v30, %v55_v29  ;;  %v94_v35 = vadd.f32 %v26_v32, %v25_v31  ;;  %v59_v36 = vld [vmem:[%s768_s0 + $0x160] sm:$0xff]  ;;  %v60_v37 = vld [vmem:[%s768_s0 + $0x168] sm:$0xff]  ;;  %v29_v38 = vld [vmem:[%s768_s0 + $0x70] sm:$0xff]  ;;  %v429_v32 = vmov 256.0  }
   0xa   :  { %v30_v39 = vld [vmem:[%s768_s0 + $0x78] sm:$0xff]  ;;  %v27_v40 = vld [vmem:[%s768_s0 + $0x60] sm:$0xff]  ;;  %v28_v41 = vld [vmem:[%s768_s0 + $0x68] sm:$0xff]  ;;  %v145_v42 = vadd.f32 %v60_v37, %v59_v36  ;;  %427 = vrcp.f32 %v429_v32 }
   0xb   :  { %v100_v43 = vadd.f32 %v30_v39, %v29_v38  ;;  %v97_v44 = vadd.f32 %v28_v41, %v27_v40  ;;  %v33_v45 = vld [vmem:[%s768_s0 + $0x90] sm:$0xff]  ;;  %v34_v46 = vld [vmem:[%s768_s0 + $0x98] sm:$0xff]  ;;  %v31_v47 = vld [vmem:[%s768_s0 + $0x80] sm:$0xff]  ;;  %v286_v41 = vlaneseq }
   0xc   :  { %131 = vadd.xlane.f32.xlu2 %v130_v15  ;;  %v32_v48 = vld [vmem:[%s768_s0 + $0x88] sm:$0xff]  ;;  %v61_v49 = vld [vmem:[%s768_s0 + $0x170] sm:$0xff]  ;;  %v62_v50 = vld [vmem:[%s768_s0 + $0x178] sm:$0xff]  ;;  %v106_v51 = vadd.f32 %v34_v46, %v33_v45 }
   0xd   :  { %89 = vadd.xlane.f32.xlu1 %v88_v16  ;;  %v103_v52 = vadd.f32 %v32_v48, %v31_v47  ;;  %v148_v53 = vadd.f32 %v62_v50, %v61_v49  ;;  %v35_v54 = vld [vmem:[%s768_s0 + $0xa0] sm:$0xff]  ;;  %v36_v55 = vld [vmem:[%s768_s0 + $0xa8] sm:$0xff]  ;;  %v65_v56 = vld [vmem:[%s768_s0 + $0x190] sm:$0xff] }
   0xe   :  { %83 = vadd.xlane.f32.xlu0 %v82_v17  ;;  %v66_v57 = vld [vmem:[%s768_s0 + $0x198] sm:$0xff]  ;;  %v63_v58 = vld [vmem:[%s768_s0 + $0x180] sm:$0xff]  ;;  %v64_v59 = vld [vmem:[%s768_s0 + $0x188] sm:$0xff]  ;;  %v109_v60 = vadd.f32 %v36_v55, %v35_v54 }
   0xf   :  { %v154_v61 = vadd.f32 %v66_v57, %v65_v56  ;;  %v151_v62 = vadd.f32 %v64_v59, %v63_v58  ;;  %v69_v63 = vld [vmem:[%s768_s0 + $0x1b0] sm:$0xff]  ;;  %v70_v0 = vld [vmem:[%s768_s0 + $0x1b8] sm:$0xff]  ;;  %v67_v1 = vld [vmem:[%s768_s0 + $0x1a0] sm:$0xff] }
  0x10   :  { %v68_v2 = vld [vmem:[%s768_s0 + $0x1a8] sm:$0xff]  ;;  %v37_v3 = vld [vmem:[%s768_s0 + $0xb0] sm:$0xff]  ;;  %v38_v4 = vld [vmem:[%s768_s0 + $0xb8] sm:$0xff]  ;;  %v160_v5 = vadd.f32 %v70_v0, %v69_v63 }
  0x11   :  { %v157_v6 = vadd.f32 %v68_v2, %v67_v1  ;;  %v112_v7 = vadd.f32 %v38_v4, %v37_v3  ;;  %v71_v8 = vld [vmem:[%s768_s0 + $0x1c0] sm:$0xff]  ;;  %v72_v9 = vld [vmem:[%s768_s0 + $0x1c8] sm:$0xff]  ;;  %v41_v10 = vld [vmem:[%s768_s0 + $0xd0] sm:$0xff] }
  0x12   :  { %v42_v11 = vld [vmem:[%s768_s0 + $0xd8] sm:$0xff]  ;;  %v39_v12 = vld [vmem:[%s768_s0 + $0xc0] sm:$0xff]  ;;  %v40_v13 = vld [vmem:[%s768_s0 + $0xc8] sm:$0xff]  ;;  %v163_v14 = vadd.f32 %v72_v9, %v71_v8 }
  0x13   :  { %v118_v15 = vadd.f32 %v42_v11, %v41_v10  ;;  %v115_v16 = vadd.f32 %v40_v13, %v39_v12  ;;  %v45_v17 = vld [vmem:[%s768_s0 + $0xf0] sm:$0xff]  ;;  %v46_v18 = vld [vmem:[%s768_s0 + $0xf8] sm:$0xff]  ;;  %v43_v19 = vld [vmem:[%s768_s0 + $0xe0] sm:$0xff] }
  0x14   :  { %92 = vadd.xlane.f32.xlu2 %v91_v24  ;;  %v44_v20 = vld [vmem:[%s768_s0 + $0xe8] sm:$0xff]  ;;  %v73_v21 = vld [vmem:[%s768_s0 + $0x1d0] sm:$0xff]  ;;  %v74_v22 = vld [vmem:[%s768_s0 + $0x1d8] sm:$0xff]  ;;  %v124_v23 = vadd.f32 %v46_v18, %v45_v17 }
  0x15   :  { %137 = vadd.xlane.f32.xlu1 %v136_v25  ;;  %v121_v24 = vadd.f32 %v44_v20, %v43_v19  ;;  %v166_v25 = vadd.f32 %v74_v22, %v73_v21  ;;  %v78_v27 = vld [vmem:[%s768_s0 + $0x1f8] sm:$0xff]  ;;  %v75_v28 = vld [vmem:[%s768_s0 + $0x1e0] sm:$0xff]  ;;  %v76_v29 = vld [vmem:[%s768_s0 + $0x1e8] sm:$0xff] }
  0x16   :  { %134 = vadd.xlane.f32.xlu0 %v133_v26  ;;  %v77_v26 = vld [vmem:[%s768_s0 + $0x1f0] sm:$0xff]  ;;  %v169_v31 = vadd.f32 %v76_v29, %v75_v28  ;;  %v425_v28 = vld [vmem:[%s769_s1 + $0x4] sm:$0xf0]  ;;  %v424_v29 = vld [vmem:[%s769_s1 + $0x4] sm:$0xf] }
  0x17   :  { %v172_v30 = vadd.f32 %v78_v27, %v77_v26  ;;  %v416_v27 = vld [vmem:[%s769_s1] sm:$0xf] }
  0x18   :  { %v417_v32 = vor.u32 %v425_v28, %v416_v27 }
  0x1a   :  { %381 = vmatpush.bf16.msra.mxu0 %v417_v32 }
  0x1c   :  { %143 = vadd.xlane.f32.xlu2 %v142_v33  ;;  %v428_v33 = vpop.eup %427 }
  0x1d   :  { %140 = vadd.xlane.f32.xlu1 %v139_v34  ;;  %v176_v34 = vmul.f32 256.0, %v428_v33  ;;  %vm180_vm0 = vweird.f32 %v428_v33 }
  0x1e   :  { %95 = vadd.xlane.f32.xlu0 %v94_v35 }
  0x1f   :  { %v177_v35 = vsub.f32 1.0, %v176_v34 }
  0x21   :  { %v178_v36 = vmul.f32 %v428_v33, %v177_v35 }
  0x23   :  { %v179_v40 = vadd.f32 %v428_v33, %v178_v36 }
  0x24   :  { %146 = vadd.xlane.f32.xlu2 %v145_v42 }
  0x25   :  { %101 = vadd.xlane.f32.xlu1 %v100_v43  ;;  %v642_v42 = vsel %vm180_vm0, %v428_v33, %v179_v40  ;;  %v644_v43 = vand.u32 127, %v286_v41  ;;  %v418_v33 = vld [vmem:[%s769_s1 + $0x8] sm:$0xf0] }
  0x26   :  { %98 = vadd.xlane.f32.xlu0 %v97_v44 }
  0x2c   :  { %107 = vadd.xlane.f32.xlu2 %v106_v51  ;;  %v651_v51 = vadd.s32 4294967288, %v644_v43 }
  0x2d   :  { %104 = vadd.xlane.f32.xlu1 %v103_v52 }
  0x2e   :  { %149 = vadd.xlane.f32.xlu0 %v148_v53 }
  0x34   :  { %110 = vadd.xlane.f32.xlu2 %v109_v60 }
  0x35   :  { %155 = vadd.xlane.f32.xlu1 %v154_v61 }
  0x36   :  { %152 = vadd.xlane.f32.xlu0 %v151_v62 }
  0x3c   :  { %161 = vadd.xlane.f32.xlu2 %v160_v5 }
  0x3d   :  { %158 = vadd.xlane.f32.xlu1 %v157_v6 }
  0x3e   :  { %113 = vadd.xlane.f32.xlu0 %v112_v7 }
  0x44   :  { %164 = vadd.xlane.f32.xlu2 %v163_v14 }
  0x45   :  { %119 = vadd.xlane.f32.xlu1 %v118_v15 }
  0x46   :  { %116 = vadd.xlane.f32.xlu0 %v115_v16 }
  0x4c   :  { %125 = vadd.xlane.f32.xlu2 %v124_v23 }
  0x4d   :  { %122 = vadd.xlane.f32.xlu1 %v121_v24 }
  0x4e   :  { %167 = vadd.xlane.f32.xlu0 %v166_v25 }
  0x55   :  { %173 = vadd.xlane.f32.xlu1 %v172_v30 }
  0x56   :  { %170 = vadd.xlane.f32.xlu0 %v169_v31 }
  0x77   :  { %v129_v37 = vpop.xlane.xlu2 %128 }
  0x78   :  { %v87_v38 = vpop.xlane.xlu1 %86  ;;  %v198_v16 = vmul.f32 %v642_v42, %v129_v37  ;;  %v421_v37 = vor.u32 %v424_v29, %v418_v33 }
  0x79   :  { %v81_v39 = vpop.xlane.xlu0 %80  ;;  %v184_v47 = vmul.f32 %v642_v42, %v87_v38 }
  0x7a   :  { %v182_v48 = vmul.f32 %v642_v42, %v81_v39  ;;  %395 = vmatpush.bf16.msra.mxu1 %v421_v37 }
  0x7f   :  { %v132_v44 = vpop.xlane.xlu2 %131 }
  0x80   :  { %v90_v45 = vpop.xlane.xlu1 %89  ;;  %v199_v17 = vmul.f32 %v642_v42, %v132_v44 }
  0x81   :  { %v84_v46 = vpop.xlane.xlu0 %83  ;;  %v185_v49 = vmul.f32 %v642_v42, %v90_v45 }
  0x82   :  { %v183_v50 = vmul.f32 %v642_v42, %v84_v46  ;;  %v222_v20 = vpack.c.bf16 %v199_v17, %v198_v16 }
  0x83   :  { %v215_v52 = vpack.c.bf16 %v185_v49, %v184_v47 }
  0x84   :  { %v214_v53 = vpack.c.bf16 %v183_v50, %v182_v48  ;;  %v270_v34 = vunpack.c.l.b16 %v222_v20  ;;  %v271_v40 = vunpack.c.h.b16 %v222_v20 }
  0x85   :  { %v256_v54 = vunpack.c.l.b16 %v215_v52  ;;  %v257_v55 = vunpack.c.h.b16 %v215_v52 }
  0x86   :  { %v254_v56 = vunpack.c.l.b16 %v214_v53  ;;  %v255_v57 = vunpack.c.h.b16 %v214_v53  ;;  %v314_v45 = vperm.slane %v270_v34, %v644_v43  ;;  %v315_v53 = vperm.slane %v271_v40, %v651_v51 }
  0x87   :  { %v293_v58 = vperm.slane %v256_v54, %v644_v43  ;;  %v294_v59 = vperm.slane %v257_v55, %v651_v51  ;;  %v93_v62 = vpop.xlane.xlu2 %92 }
  0x88   :  { %v288_v60 = vperm.slane %v254_v56, %v644_v43  ;;  %v290_v61 = vperm.slane %v255_v57, %v651_v51  ;;  %v138_v63 = vpop.xlane.xlu1 %137  ;;  %v186_v22 = vmul.f32 %v642_v42, %v93_v62 }
  0x89   :  { %v135_v0 = vpop.xlane.xlu0 %134  ;;  %v295_v1 = vsel %vm291_vm1, %v294_v59, %v293_v58  ;;  %v201_v18 = vmul.f32 %v642_v42, %v138_v63 }
  0x8a   :  { %v292_v2 = vsel %vm291_vm1, %v290_v61, %v288_v60  ;;  %v200_v19 = vmul.f32 %v642_v42, %v135_v0 }
  0x8b   :  { %v660_v3 = vsel %vm338_vm2, %v295_v1, %v292_v2 }
  0x8c   :  { %v223_v21 = vpack.c.bf16 %v201_v18, %v200_v19 }
  0x8e   :  { %v272_v35 = vunpack.c.l.b16 %v223_v21  ;;  %v273_v36 = vunpack.c.h.b16 %v223_v21 }
  0x8f   :  { %v144_v4 = vpop.xlane.xlu2 %143 }
  0x90   :  { %v141_v5 = vpop.xlane.xlu1 %140  ;;  %v203_v23 = vmul.f32 %v642_v42, %v144_v4  ;;  %v317_v46 = vperm.slane %v272_v35, %v644_v43  ;;  %v318_v47 = vperm.slane %v273_v36, %v651_v51  ;;  %v316_v4 = vsel %vm291_vm1, %v315_v53, %v314_v45 }
  0x91   :  { %v96_v6 = vpop.xlane.xlu0 %95  ;;  %v202_v24 = vmul.f32 %v642_v42, %v141_v5 }
  0x92   :  { %v187_v25 = vmul.f32 %v642_v42, %v96_v6  ;;  %v319_v60 = vsel %vm291_vm1, %v318_v47, %v317_v46 }
  0x93   :  { %v224_v38 = vpack.c.bf16 %v203_v23, %v202_v24 }
  0x94   :  { %v216_v39 = vpack.c.bf16 %v187_v25, %v186_v22 }
  0x95   :  { %v274_v48 = vunpack.c.l.b16 %v224_v38  ;;  %v275_v49 = vunpack.c.h.b16 %v224_v38 }
  0x96   :  { %v258_v50 = vunpack.c.l.b16 %v216_v39  ;;  %v259_v52 = vunpack.c.h.b16 %v216_v39 }
  0x97   :  { %v147_v7 = vpop.xlane.xlu2 %146  ;;  %v320_v63 = vperm.slane %v274_v48, %v644_v43  ;;  %v321_v0 = vperm.slane %v275_v49, %v651_v51 }
  0x98   :  { %v102_v8 = vpop.xlane.xlu1 %101  ;;  %v204_v54 = vmul.f32 %v642_v42, %v147_v7  ;;  %v296_v1 = vperm.slane %v258_v50, %v644_v43  ;;  %v297_v2 = vperm.slane %v259_v52, %v651_v51 }
  0x99   :  { %v99_v9 = vpop.xlane.xlu0 %98  ;;  %v189_v41 = vmul.f32 %v642_v42, %v102_v8  ;;  %v322_v19 = vsel %vm291_vm1, %v321_v0, %v320_v63 }
  0x9a   :  { %v188_v44 = vmul.f32 %v642_v42, %v99_v9  ;;  %v298_v20 = vsel %vm291_vm1, %v297_v2, %v296_v1 }
  0x9b   :  { %v341_v36 = vsel %vm340_vm3, %v298_v20, %v660_v3 }
  0x9c   :  { %v217_v55 = vpack.c.bf16 %v189_v41, %v188_v44 }
  0x9e   :  { %v260_v5 = vunpack.c.l.b16 %v217_v55  ;;  %v261_v6 = vunpack.c.h.b16 %v217_v55 }
  0x9f   :  { %v108_v10 = vpop.xlane.xlu2 %107 }
  0xa0   :  { %v105_v11 = vpop.xlane.xlu1 %104  ;;  %v191_v61 = vmul.f32 %v642_v42, %v108_v10  ;;  %v299_v21 = vperm.slane %v260_v5, %v644_v43 }
  0xa1   :  { %v150_v12 = vpop.xlane.xlu0 %149  ;;  %v190_v62 = vmul.f32 %v642_v42, %v105_v11 }
  0xa2   :  { %v205_v56 = vmul.f32 %v642_v42, %v150_v12  ;;  %v352_v12 = vsel %vm338_vm2, %v319_v60, %v316_v4 }
  0xa3   :  { %v218_v16 = vpack.c.bf16 %v191_v61, %v190_v62  ;;  %v353_v35 = vsel %vm340_vm3, %v322_v19, %v352_v12 }
  0xa4   :  { %v225_v7 = vpack.c.bf16 %v205_v56, %v204_v54 }
  0xa5   :  { %v263_v37 = vunpack.c.h.b16 %v218_v16 }
  0xa6   :  { %v276_v22 = vunpack.c.l.b16 %v225_v7  ;;  %v277_v23 = vunpack.c.h.b16 %v225_v7 }
  0xa7   :  { %v662_v13 = vpop.xlane.xlu2 %110 }
  0xa8   :  { %v156_v14 = vpop.xlane.xlu1 %155  ;;  %v192_v17 = vmul.f32 %v642_v42, %v662_v13  ;;  %v323_v39 = vperm.slane %v276_v22, %v644_v43  ;;  %v324_v40 = vperm.slane %v277_v23, %v651_v51 }
  0xa9   :  { %v153_v15 = vpop.xlane.xlu0 %152  ;;  %v207_v8 = vmul.f32 %v642_v42, %v156_v14 }
  0xaa   :  { %v206_v9 = vmul.f32 %v642_v42, %v153_v15 }
  0xac   :  { %v226_v13 = vpack.c.bf16 %v207_v8, %v206_v9 }
  0xae   :  { %v278_v45 = vunpack.c.l.b16 %v226_v13  ;;  %v279_v46 = vunpack.c.h.b16 %v226_v13 }
  0xaf   :  { %v162_v26 = vpop.xlane.xlu2 %161 }
  0xb0   :  { %v159_v30 = vpop.xlane.xlu1 %158  ;;  %v209_v10 = vmul.f32 %v642_v42, %v162_v26  ;;  %v300_v26 = vperm.slane %v261_v6, %v651_v51  ;;  %v326_v61 = vperm.slane %v278_v45, %v644_v43  ;;  %v327_v62 = vperm.slane %v279_v46, %v651_v51 }
  0xb1   :  { %v114_v31 = vpop.xlane.xlu0 %113  ;;  %v208_v11 = vmul.f32 %v642_v42, %v159_v30 }
  0xb2   :  { %v193_v18 = vmul.f32 %v642_v42, %v114_v31  ;;  %v262_v31 = vunpack.c.l.b16 %v218_v16  ;;  %v301_v49 = vsel %vm291_vm1, %v300_v26, %v299_v21 }
  0xb3   :  { %v227_v27 = vpack.c.bf16 %v209_v10, %v208_v11  ;;  %v343_v19 = vsel %vm342_vm4, %v301_v49, %v341_v36 }
  0xb4   :  { %v219_v32 = vpack.c.bf16 %v193_v18, %v192_v17  ;;  %v302_v50 = vperm.slane %v262_v31, %v644_v43 }
  0xb5   :  { %v280_v47 = vunpack.c.l.b16 %v227_v27  ;;  %v281_v48 = vunpack.c.h.b16 %v227_v27 }
  0xb6   :  { %v264_v52 = vunpack.c.l.b16 %v219_v32  ;;  %v265_v53 = vunpack.c.h.b16 %v219_v32 }
  0xb7   :  { %v165_v57 = vpop.xlane.xlu2 %164  ;;  %v329_v63 = vperm.slane %v280_v47, %v644_v43  ;;  %v330_v0 = vperm.slane %v281_v48, %v651_v51 }
  0xb8   :  { %v120_v58 = vpop.xlane.xlu1 %119  ;;  %v210_v24 = vmul.f32 %v642_v42, %v165_v57  ;;  %v303_v57 = vperm.slane %v263_v37, %v651_v51  ;;  %v305_v4 = vperm.slane %v264_v52, %v644_v43  ;;  %v306_v5 = vperm.slane %v265_v53, %v651_v51 }
  0xb9   :  { %v117_v59 = vpop.xlane.xlu0 %116  ;;  %v195_v14 = vmul.f32 %v642_v42, %v120_v58  ;;  %v325_v58 = vsel %vm291_vm1, %v324_v40, %v323_v39 }
  0xba   :  { %v194_v15 = vmul.f32 %v642_v42, %v117_v59  ;;  %v304_v12 = vsel %vm291_vm1, %v303_v57, %v302_v50  ;;  %v354_v20 = vsel %vm342_vm4, %v325_v58, %v353_v35 }
  0xbc   :  { %v220_v38 = vpack.c.bf16 %v195_v14, %v194_v15  ;;  %v331_v14 = vsel %vm291_vm1, %v330_v0, %v329_v63  ;;  %v307_v15 = vsel %vm291_vm1, %v306_v5, %v305_v4 }
  0xbe   :  { %v266_v3 = vunpack.c.l.b16 %v220_v38  ;;  %v267_v54 = vunpack.c.h.b16 %v220_v38 }
  0xbf   :  { %v126_v25 = vpop.xlane.xlu2 %125 }
  0xc0   :  { %v197_v28 = vmul.f32 %v642_v42, %v126_v25  ;;  %v123_v29 = vpop.xlane.xlu1 %122  ;;  %v308_v8 = vperm.slane %v266_v3, %v644_v43  ;;  %v309_v9 = vperm.slane %v267_v54, %v651_v51  ;;  %v345_v25 = vsel %vm344_vm5, %v304_v12, %v343_v19 }
  0xc1   :  { %v168_v30 = vpop.xlane.xlu0 %167  ;;  %v196_v33 = vmul.f32 %v642_v42, %v123_v29  ;;  %v347_v29 = vsel %vm346_vm6, %v307_v15, %v345_v25 }
  0xc2   :  { %v211_v34 = vmul.f32 %v642_v42, %v168_v30  ;;  %v310_v23 = vsel %vm291_vm1, %v309_v9, %v308_v8 }
  0xc3   :  { %v221_v41 = vpack.c.bf16 %v197_v28, %v196_v33  ;;  %v349_v32 = vsel %vm348_vm7, %v310_v23, %v347_v29 }
  0xc4   :  { %v228_v44 = vpack.c.bf16 %v211_v34, %v210_v24 }
  0xc5   :  { %v268_v59 = vunpack.c.l.b16 %v221_v41  ;;  %v269_v60 = vunpack.c.h.b16 %v221_v41 }
  0xc6   :  { %v282_v55 = vunpack.c.l.b16 %v228_v44  ;;  %v283_v56 = vunpack.c.h.b16 %v228_v44 }
  0xc7   :  { %v311_v16 = vperm.slane %v268_v59, %v644_v43  ;;  %v312_v17 = vperm.slane %v269_v60, %v651_v51 }
  0xc8   :  { %v174_v1 = vpop.xlane.xlu1 %173  ;;  %v332_v10 = vperm.slane %v282_v55, %v644_v43  ;;  %v333_v11 = vperm.slane %v283_v56, %v651_v51 }
  0xc9   :  { %v171_v2 = vpop.xlane.xlu0 %170  ;;  %v213_v6 = vmul.f32 %v642_v42, %v174_v1  ;;  %v313_v27 = vsel %vm291_vm1, %v312_v17, %v311_v16 }
  0xca   :  { %v212_v7 = vmul.f32 %v642_v42, %v171_v2  ;;  %v328_v42 = vsel %vm291_vm1, %v327_v62, %v326_v61  ;;  %v334_v24 = vsel %vm291_vm1, %v333_v11, %v332_v10  ;;  %v351_v34 = vsel %vm350_vm8, %v313_v27, %v349_v32 }
  0xcb   :  { %v355_v28 = vsel %vm344_vm5, %v328_v42, %v354_v20 }
  0xcc   :  { %v229_v18 = vpack.c.bf16 %v213_v6, %v212_v7  ;;  %v356_v30 = vsel %vm346_vm6, %v331_v14, %v355_v28 }
  0xcd   :  { %v357_v33 = vsel %vm348_vm7, %v334_v24, %v356_v30 }
  0xce   :  { %v284_v21 = vunpack.c.l.b16 %v229_v18  ;;  %v285_v22 = vunpack.c.h.b16 %v229_v18 }
  0xd0   :  { %v335_v26 = vperm.slane %v284_v21, %v644_v43  ;;  %v336_v13 = vperm.slane %v285_v22, %v651_v51  ;;  %v232_v51 = vld [vmem:[%s770_s2] sm:$0x3] }
  0xd1   :  { %v234_v36 = vperm.slane %v232_v51, 0  ;;  %v235_v37 = vperm.slane %v232_v51, 1 }
  0xd2   :  { %v337_v31 = vsel %vm291_vm1, %v336_v13, %v335_v26 }
  0xd3   :  { %v358_v35 = vsel %vm350_vm8, %v337_v31, %v357_v33 }
  0xd4   :  { %v359_v43 = vpack.c.b16 %v358_v35, %v351_v34 }
  0xd6   :  { %422 = vmatmul.msk.bf16.vlgmr.msra.gmra.mxu0 %vm370_vm9, %v359_v43  ;;  %423 = vmatmul.msk.bf16.vlgmr.msra.gmra.mxu1 %vm370_vm9, %v359_v43 }
 0x153   :  { %v383_v38 = vpop.f32.mrf.mxu0  ;;  %v397_v39 = vpop.f32.mrf.mxu1 }
 0x154   :  { %v384_v40 = vadd.f32 %v383_v38, %v234_v36  ;;  %v398_v41 = vadd.f32 %v397_v39, %v235_v37 }
 0x156   :  { %v402_v44 = vmax.f32 %v384_v40, 0.0  ;;  %v403_v45 = vmax.f32 %v398_v41, 0.0 }
 0x158   :  { %v406_v46 = vpack.c.bf16 %v403_v45, %v402_v44 }
 0x15a   :  { %408 = vst [vmem:[%s771_s3] sm:$0xff] %v406_v46 }
 0x15b   :  { %v385_v47 = vpop.f32.mrf.mxu0  ;;  %v399_v48 = vpop.f32.mrf.mxu1 }
 0x15c   :  { %v386_v49 = vadd.f32 %v385_v47, %v234_v36  ;;  %v400_v50 = vadd.f32 %v399_v48, %v235_v37 }
 0x15e   :  { %v404_v52 = vmax.f32 %v386_v49, 0.0  ;;  %v405_v53 = vmax.f32 %v400_v50, 0.0 }
 0x160   :  { %v407_v3 = vpack.c.bf16 %v405_v53, %v404_v52 }
 0x162   :  { %409 = vst [vmem:[%s771_s3 + $0x8] sm:$0xff] %v407_v3 }

// kernel: fast0tag_forward.6
= control target key start
LH: loop header
LB: loop body
LE: loop exit
PB: predicated region body
PF: predicated region fallthrough
CT: control target
= control target key end

     0   :  { %s1383_s1 = inlined_call_operand.vmem [shape: bf16[512,256], index: 1, kind: input, shape index: {}]   ;;  %s1384_s0 = inlined_call_operand.vmem [shape: bf16[16,512], index: 0, kind: input, shape index: {}]   ;;  %s1385_s2 = inlined_call_operand.vmem [shape: f32[1,256], index: 2, kind: input, shape index: {}]   ;;  %s1386_s3 = inlined_call_operand.vmem [shape: bf16[16,256], index: 3, kind: output, shape index: {}]  }
   0x1   :  { %v664_v0 = vld [vmem:[%s1383_s1 + $0x70] sm:$0xf]  ;;  %v881_v1 = vld [vmem:[%s1383_s1 + $0x74] sm:$0xf0]  ;;  %v656_v11 = vld [vmem:[%s1383_s1 + $0x60] sm:$0xf] }
   0x2   :  { %v728_v2 = vld [vmem:[%s1383_s1 + $0xf0] sm:$0xf]  ;;  %v665_v3 = vor.u32 %v881_v1, %v664_v0  ;;  %v897_v4 = vld [vmem:[%s1383_s1 + $0xf4] sm:$0xf0]  ;;  %v879_v13 = vld [vmem:[%s1383_s1 + $0x64] sm:$0xf0] }
   0x3   :  { %v792_v5 = vld [vmem:[%s1383_s1 + $0x170] sm:$0xf]  ;;  %v913_v6 = vld [vmem:[%s1383_s1 + $0x174] sm:$0xf0]  ;;  %v729_v7 = vor.u32 %v897_v4, %v728_v2  ;;  %v720_v14 = vld [vmem:[%s1383_s1 + $0xe0] sm:$0xf]  ;;  %v657_v16 = vor.u32 %v879_v13, %v656_v11 }
   0x4   :  { %v793_v8 = vor.u32 %v913_v6, %v792_v5  ;;  %v856_v9 = vld [vmem:[%s1383_s1 + $0x1f0] sm:$0xf]  ;;  %v929_v10 = vld [vmem:[%s1383_s1 + $0x1f4] sm:$0xf0]  ;;  %439 = vmatpush.bf16.msra.mxu0 %v665_v3  ;;  %v895_v15 = vld [vmem:[%s1383_s1 + $0xe4] sm:$0xf0] }
   0x5   :  { %v857_v12 = vor.u32 %v929_v10, %v856_v9  ;;  %453 = vmatpush.bf16.msra.mxu1 %v729_v7  ;;  %v721_v17 = vor.u32 %v895_v15, %v720_v14  ;;  %v784_v18 = vld [vmem:[%s1383_s1 + $0x160] sm:$0xf]  ;;  %v911_v19 = vld [vmem:[%s1383_s1 + $0x164] sm:$0xf0]  ;;  %v648_v23 = vld [vmem:[%s1383_s1 + $0x50] sm:$0xf] }
   0x6   :  { %467 = vmatpush.bf16.msra.mxu2 %v793_v8  ;;  %v848_v20 = vld [vmem:[%s1383_s1 + $0x1e0] sm:$0xf]  ;;  %v785_v21 = vor.u32 %v911_v19, %v784_v18  ;;  %v927_v22 = vld [vmem:[%s1383_s1 + $0x1e4] sm:$0xf0]  ;;  %v877_v24 = vld [vmem:[%s1383_s1 + $0x54] sm:$0xf0] }
   0x7   :  { %481 = vmatpush.bf16.msra.mxu3 %v857_v12  ;;  %v849_v25 = vor.u32 %v927_v22, %v848_v20  ;;  %v712_v26 = vld [vmem:[%s1383_s1 + $0xd0] sm:$0xf]  ;;  %v893_v27 = vld [vmem:[%s1383_s1 + $0xd4] sm:$0xf0]  ;;  %v649_v29 = vor.u32 %v877_v24, %v648_v23  ;;  %v640_v35 = vld [vmem:[%s1383_s1 + $0x40] sm:$0xf] }
   0x8   :  { %v776_v28 = vld [vmem:[%s1383_s1 + $0x150] sm:$0xf]  ;;  %440 = vmatpush.bf16.msra.mxu0 %v657_v16  ;;  %v909_v30 = vld [vmem:[%s1383_s1 + $0x154] sm:$0xf0]  ;;  %v713_v33 = vor.u32 %v893_v27, %v712_v26  ;;  %v875_v36 = vld [vmem:[%s1383_s1 + $0x44] sm:$0xf0] }
   0x9   :  { %v840_v31 = vld [vmem:[%s1383_s1 + $0x1d0] sm:$0xf]  ;;  %v925_v32 = vld [vmem:[%s1383_s1 + $0x1d4] sm:$0xf0]  ;;  %454 = vmatpush.bf16.msra.mxu1 %v721_v17  ;;  %v777_v34 = vor.u32 %v909_v30, %v776_v28  ;;  %v704_v37 = vld [vmem:[%s1383_s1 + $0xc0] sm:$0xf]  ;;  %v641_v44 = vor.u32 %v875_v36, %v640_v35 }
   0xa   :  { %468 = vmatpush.bf16.msra.mxu2 %v785_v21  ;;  %v841_v38 = vor.u32 %v925_v32, %v840_v31  ;;  %v891_v39 = vld [vmem:[%s1383_s1 + $0xc4] sm:$0xf0]  ;;  %v768_v40 = vld [vmem:[%s1383_s1 + $0x140] sm:$0xf]  ;;  %v632_v47 = vld [vmem:[%s1383_s1 + $0x30] sm:$0xf] }
   0xb   :  { %482 = vmatpush.bf16.msra.mxu3 %v849_v25  ;;  %v907_v41 = vld [vmem:[%s1383_s1 + $0x144] sm:$0xf0]  ;;  %v832_v42 = vld [vmem:[%s1383_s1 + $0x1c0] sm:$0xf]  ;;  %v705_v45 = vor.u32 %v891_v39, %v704_v37  ;;  %v873_v48 = vld [vmem:[%s1383_s1 + $0x34] sm:$0xf0] }
   0xc   :  { %v923_v43 = vld [vmem:[%s1383_s1 + $0x1c4] sm:$0xf0]  ;;  %441 = vmatpush.bf16.msra.mxu0 %v649_v29  ;;  %v769_v46 = vor.u32 %v907_v41, %v768_v40  ;;  %v696_v49 = vld [vmem:[%s1383_s1 + $0xb0] sm:$0xf]  ;;  %v889_v51 = vld [vmem:[%s1383_s1 + $0xb4] sm:$0xf0]  ;;  %v633_v56 = vor.u32 %v873_v48, %v632_v47 }
   0xd   :  { %455 = vmatpush.bf16.msra.mxu1 %v713_v33  ;;  %v833_v50 = vor.u32 %v923_v43, %v832_v42  ;;  %v760_v52 = vld [vmem:[%s1383_s1 + $0x130] sm:$0xf]  ;;  %v905_v53 = vld [vmem:[%s1383_s1 + $0x134] sm:$0xf0]  ;;  %v697_v57 = vor.u32 %v889_v51, %v696_v49  ;;  %v624_v59 = vld [vmem:[%s1383_s1 + $0x20] sm:$0xf] }
   0xe   :  { %469 = vmatpush.bf16.msra.mxu2 %v777_v34  ;;  %v824_v54 = vld [vmem:[%s1383_s1 + $0x1b0] sm:$0xf]  ;;  %v921_v55 = vld [vmem:[%s1383_s1 + $0x1b4] sm:$0xf0]  ;;  %v761_v58 = vor.u32 %v905_v53, %v760_v52  ;;  %v871_v60 = vld [vmem:[%s1383_s1 + $0x24] sm:$0xf0] }
   0xf   :  { %483 = vmatpush.bf16.msra.mxu3 %v841_v38  ;;  %v688_v61 = vld [vmem:[%s1383_s1 + $0xa0] sm:$0xf]  ;;  %v825_v62 = vor.u32 %v921_v55, %v824_v54  ;;  %v887_v63 = vld [vmem:[%s1383_s1 + $0xa4] sm:$0xf0]  ;;  %v625_v4 = vor.u32 %v871_v60, %v624_v59  ;;  %v616_v7 = vld [vmem:[%s1383_s1 + $0x10] sm:$0xf] }
  0x10   :  { %442 = vmatpush.bf16.msra.mxu0 %v641_v44  ;;  %v752_v0 = vld [vmem:[%s1383_s1 + $0x120] sm:$0xf]  ;;  %v903_v1 = vld [vmem:[%s1383_s1 + $0x124] sm:$0xf0]  ;;  %v689_v5 = vor.u32 %v887_v63, %v688_v61  ;;  %v869_v8 = vld [vmem:[%s1383_s1 + $0x14] sm:$0xf0] }
  0x11   :  { %456 = vmatpush.bf16.msra.mxu1 %v705_v45  ;;  %v816_v2 = vld [vmem:[%s1383_s1 + $0x1a0] sm:$0xf]  ;;  %v919_v3 = vld [vmem:[%s1383_s1 + $0x1a4] sm:$0xf0]  ;;  %v753_v6 = vor.u32 %v903_v1, %v752_v0  ;;  %v680_v9 = vld [vmem:[%s1383_s1 + $0x90] sm:$0xf]  ;;  %v617_v17 = vor.u32 %v869_v8, %v616_v7 }
  0x12   :  { %470 = vmatpush.bf16.msra.mxu2 %v769_v46  ;;  %v817_v10 = vor.u32 %v919_v3, %v816_v2  ;;  %v885_v11 = vld [vmem:[%s1383_s1 + $0x94] sm:$0xf0]  ;;  %v744_v12 = vld [vmem:[%s1383_s1 + $0x110] sm:$0xf]  ;;  %v608_v16 = vld [vmem:[%s1383_s1] sm:$0xf] }
  0x13   :  { %484 = vmatpush.bf16.msra.mxu3 %v833_v50  ;;  %v901_v13 = vld [vmem:[%s1383_s1 + $0x114] sm:$0xf0]  ;;  %v808_v14 = vld [vmem:[%s1383_s1 + $0x190] sm:$0xf]  ;;  %v867_v18 = vld [vmem:[%s1383_s1 + $0x4] sm:$0xf0]  ;;  %v681_v21 = vor.u32 %v885_v11, %v680_v9 }
  0x14   :  { %443 = vmatpush.bf16.msra.mxu0 %v633_v56  ;;  %v917_v15 = vld [vmem:[%s1383_s1 + $0x194] sm:$0xf0]  ;;  %v672_v19 = vld [vmem:[%s1383_s1 + $0x80] sm:$0xf]  ;;  %v883_v20 = vld [vmem:[%s1383_s1 + $0x84] sm:$0xf0]  ;;  %v745_v22 = vor.u32 %v901_v13, %v744_v12  ;;  %v609_v33 = vor.u32 %v867_v18, %v608_v16 }
  0x15   :  { %457 = vmatpush.bf16.msra.mxu1 %v697_v57  ;;  %v736_v23 = vld [vmem:[%s1383_s1 + $0x100] sm:$0xf]  ;;  %v899_v24 = vld [vmem:[%s1383_s1 + $0x104] sm:$0xf0]  ;;  %v809_v26 = vor.u32 %v917_v15, %v808_v14  ;;  %v880_v28 = vld [vmem:[%s1383_s1 + $0x74] sm:$0xf]  ;;  %v673_v37 = vor.u32 %v883_v20, %v672_v19 }
  0x16   :  { %471 = vmatpush.bf16.msra.mxu2 %v761_v58  ;;  %v800_v25 = vld [vmem:[%s1383_s1 + $0x180] sm:$0xf]  ;;  %v915_v27 = vld [vmem:[%s1383_s1 + $0x184] sm:$0xf0]  ;;  %v666_v29 = vld [vmem:[%s1383_s1 + $0x78] sm:$0xf0]  ;;  %v737_v38 = vor.u32 %v899_v24, %v736_v23 }
  0x17   :  { %485 = vmatpush.bf16.msra.mxu3 %v825_v62  ;;  %v896_v30 = vld [vmem:[%s1383_s1 + $0xf4] sm:$0xf]  ;;  %v730_v31 = vld [vmem:[%s1383_s1 + $0xf8] sm:$0xf0]  ;;  %v878_v39 = vld [vmem:[%s1383_s1 + $0x64] sm:$0xf]  ;;  %v801_v43 = vor.u32 %v915_v27, %v800_v25  ;;  %v669_v44 = vor.u32 %v880_v28, %v666_v29 }
  0x18   :  { %444 = vmatpush.bf16.msra.mxu0 %v625_v4  ;;  %v912_v32 = vld [vmem:[%s1383_s1 + $0x174] sm:$0xf]  ;;  %v794_v34 = vld [vmem:[%s1383_s1 + $0x178] sm:$0xf0]  ;;  %v658_v40 = vld [vmem:[%s1383_s1 + $0x68] sm:$0xf0]  ;;  %v733_v49 = vor.u32 %v896_v30, %v730_v31 }
  0x19   :  { %458 = vmatpush.bf16.msra.mxu1 %v689_v5  ;;  %v928_v35 = vld [vmem:[%s1383_s1 + $0x1f4] sm:$0xf]  ;;  %v858_v36 = vld [vmem:[%s1383_s1 + $0x1f8] sm:$0xf0]  ;;  %v600_v41 = vld [vmem:[%s1384_s0 + $0x8] sm:$0xf]  ;;  %v797_v50 = vor.u32 %v912_v32, %v794_v34  ;;  %v661_v63 = vor.u32 %v878_v39, %v658_v40 }
  0x1a   :  { %472 = vmatpush.bf16.msra.mxu2 %v753_v6  ;;  %v865_v42 = vld [vmem:[%s1384_s0 + $0x14] sm:$0xf0]  ;;  %v894_v45 = vld [vmem:[%s1383_s1 + $0xe4] sm:$0xf]  ;;  %v722_v46 = vld [vmem:[%s1383_s1 + $0xe8] sm:$0xf0]  ;;  %v861_v54 = vor.u32 %v928_v35, %v858_v36 }
  0x1b   :  { %486 = vmatpush.bf16.msra.mxu3 %v817_v10  ;;  %v910_v47 = vld [vmem:[%s1383_s1 + $0x164] sm:$0xf]  ;;  %v786_v48 = vld [vmem:[%s1383_s1 + $0x168] sm:$0xf0]  ;;  %v602_v52 = vld [vmem:[%s1384_s0 + $0x18] sm:$0xf0]  ;;  %v1199_v55 = vor.u32 %v865_v42, %v600_v41  ;;  %v725_v1 = vor.u32 %v894_v45, %v722_v46 }
  0x1c   :  { %445 = vmatpush.bf16.msra.mxu0 %v617_v17  ;;  %v863_v51 = vld [vmem:[%s1384_s0 + $0xc] sm:$0xf]  ;;  %v592_v53 = vld [vmem:[%s1384_s0] sm:$0xf]  ;;  %v864_v56 = vld [vmem:[%s1384_s0 + $0xc] sm:$0xf0]  ;;  %v789_v2 = vor.u32 %v910_v47, %v786_v48 }
  0x1d   :  { %459 = vmatpush.bf16.msra.mxu1 %v681_v21  ;;  %v862_v57 = vld [vmem:[%s1384_s0 + $0x4] sm:$0xf]  ;;  %v594_v58 = vld [vmem:[%s1384_s0 + $0x10] sm:$0xf0]  ;;  %v850_v60 = vld [vmem:[%s1383_s1 + $0x1e8] sm:$0xf0]  ;;  %v1216_v61 = vor.u32 %v863_v51, %v602_v52  ;;  %v1218_v62 = vor.u32 %v864_v56, %v592_v53 }
  0x1e   :  { %473 = vmatpush.bf16.msra.mxu2 %v745_v22  ;;  %v926_v59 = vld [vmem:[%s1383_s1 + $0x1e4] sm:$0xf]  ;;  %v1220_v0 = vor.u32 %v862_v57, %v594_v58  ;;  %v876_v3 = vld [vmem:[%s1383_s1 + $0x54] sm:$0xf]  ;;  %v650_v4 = vld [vmem:[%s1383_s1 + $0x58] sm:$0xf0] }
  0x1f   :  { %487 = vmatpush.bf16.msra.mxu3 %v809_v26  ;;  %v892_v5 = vld [vmem:[%s1383_s1 + $0xd4] sm:$0xf]  ;;  %v853_v6 = vor.u32 %v926_v59, %v850_v60  ;;  %v714_v7 = vld [vmem:[%s1383_s1 + $0xd8] sm:$0xf0]  ;;  %v653_v12 = vor.u32 %v876_v3, %v650_v4  ;;  %v874_v15 = vld [vmem:[%s1383_s1 + $0x44] sm:$0xf] }
  0x20   :  { %446 = vmatpush.bf16.msra.mxu0 %v609_v33  ;;  %v908_v8 = vld [vmem:[%s1383_s1 + $0x154] sm:$0xf]  ;;  %v778_v9 = vld [vmem:[%s1383_s1 + $0x158] sm:$0xf0]  ;;  %v717_v13 = vor.u32 %v892_v5, %v714_v7  ;;  %v642_v16 = vld [vmem:[%s1383_s1 + $0x48] sm:$0xf0] }
  0x21   :  { %460 = vmatpush.bf16.msra.mxu1 %v673_v37  ;;  %v924_v10 = vld [vmem:[%s1383_s1 + $0x1d4] sm:$0xf]  ;;  %v842_v11 = vld [vmem:[%s1383_s1 + $0x1d8] sm:$0xf0]  ;;  %v781_v14 = vor.u32 %v908_v8, %v778_v9  ;;  %v890_v17 = vld [vmem:[%s1383_s1 + $0xc4] sm:$0xf]  ;;  %v645_v24 = vor.u32 %v874_v15, %v642_v16 }
  0x22   :  { %474 = vmatpush.bf16.msra.mxu2 %v737_v38  ;;  %v845_v18 = vor.u32 %v924_v10, %v842_v11  ;;  %v706_v19 = vld [vmem:[%s1383_s1 + $0xc8] sm:$0xf0]  ;;  %v906_v20 = vld [vmem:[%s1383_s1 + $0x144] sm:$0xf]  ;;  %v872_v27 = vld [vmem:[%s1383_s1 + $0x34] sm:$0xf] }
  0x23   :  { %488 = vmatpush.bf16.msra.mxu3 %v801_v43  ;;  %447 = vmatmul.bf16.vlgmr.msra.gmra.mxu0 %v1218_v62  ;;  %v770_v21 = vld [vmem:[%s1383_s1 + $0x148] sm:$0xf0]  ;;  %v922_v22 = vld [vmem:[%s1383_s1 + $0x1c4] sm:$0xf]  ;;  %v709_v25 = vor.u32 %v890_v17, %v706_v19  ;;  %v634_v28 = vld [vmem:[%s1383_s1 + $0x38] sm:$0xf0] }
  0x24   :  { %495 = vmatpush.bf16.msrb.mxu0 %v669_v44  ;;  %461 = vmatmul.bf16.vlgmr.msra.gmra.mxu1 %v1220_v0  ;;  %v834_v23 = vld [vmem:[%s1383_s1 + $0x1c8] sm:$0xf0]  ;;  %v773_v26 = vor.u32 %v906_v20, %v770_v21  ;;  %v888_v29 = vld [vmem:[%s1383_s1 + $0xb4] sm:$0xf]  ;;  %v698_v31 = vld [vmem:[%s1383_s1 + $0xb8] sm:$0xf0]  ;;  %v637_v36 = vor.u32 %v872_v27, %v634_v28 }
  0x25   :  { %509 = vmatpush.bf16.msrb.mxu1 %v733_v49  ;;  %475 = vmatmul.bf16.vlgmr.msra.gmra.mxu2 %v1199_v55  ;;  %v837_v30 = vor.u32 %v922_v22, %v834_v23  ;;  %v904_v32 = vld [vmem:[%s1383_s1 + $0x134] sm:$0xf]  ;;  %v762_v33 = vld [vmem:[%s1383_s1 + $0x138] sm:$0xf0]  ;;  %v701_v37 = vor.u32 %v888_v29, %v698_v31  ;;  %v870_v39 = vld [vmem:[%s1383_s1 + $0x24] sm:$0xf] }
  0x26   :  { %523 = vmatpush.bf16.msrb.mxu2 %v797_v50  ;;  %489 = vmatmul.bf16.vlgmr.msra.gmra.mxu3 %v1216_v61  ;;  %v920_v34 = vld [vmem:[%s1383_s1 + $0x1b4] sm:$0xf]  ;;  %v826_v35 = vld [vmem:[%s1383_s1 + $0x1b8] sm:$0xf0]  ;;  %v765_v38 = vor.u32 %v904_v32, %v762_v33  ;;  %v626_v40 = vld [vmem:[%s1383_s1 + $0x28] sm:$0xf0] }
  0x27   :  { %537 = vmatpush.bf16.msrb.mxu3 %v861_v54  ;;  %v886_v41 = vld [vmem:[%s1383_s1 + $0xa4] sm:$0xf]  ;;  %v829_v42 = vor.u32 %v920_v34, %v826_v35  ;;  %v690_v43 = vld [vmem:[%s1383_s1 + $0xa8] sm:$0xf0]  ;;  %v629_v48 = vor.u32 %v870_v39, %v626_v40  ;;  %v868_v51 = vld [vmem:[%s1383_s1 + $0x14] sm:$0xf] }
  0x28   :  { %496 = vmatpush.bf16.msrb.mxu0 %v661_v63  ;;  %v902_v44 = vld [vmem:[%s1383_s1 + $0x124] sm:$0xf]  ;;  %v754_v45 = vld [vmem:[%s1383_s1 + $0x128] sm:$0xf0]  ;;  %v693_v49 = vor.u32 %v886_v41, %v690_v43  ;;  %v618_v52 = vld [vmem:[%s1383_s1 + $0x18] sm:$0xf0] }
  0x29   :  { %510 = vmatpush.bf16.msrb.mxu1 %v725_v1  ;;  %v918_v46 = vld [vmem:[%s1383_s1 + $0x1a4] sm:$0xf]  ;;  %v818_v47 = vld [vmem:[%s1383_s1 + $0x1a8] sm:$0xf0]  ;;  %v757_v50 = vor.u32 %v902_v44, %v754_v45  ;;  %v884_v53 = vld [vmem:[%s1383_s1 + $0x94] sm:$0xf]  ;;  %v621_v63 = vor.u32 %v868_v51, %v618_v52 }
  0x2a   :  { %524 = vmatpush.bf16.msrb.mxu2 %v789_v2  ;;  %v821_v54 = vor.u32 %v918_v46, %v818_v47  ;;  %v682_v56 = vld [vmem:[%s1383_s1 + $0x98] sm:$0xf0]  ;;  %v900_v57 = vld [vmem:[%s1383_s1 + $0x114] sm:$0xf]  ;;  %v866_v3 = vld [vmem:[%s1383_s1 + $0x4] sm:$0xf] }
  0x2b   :  { %538 = vmatpush.bf16.msrb.mxu3 %v853_v6  ;;  %v746_v58 = vld [vmem:[%s1383_s1 + $0x118] sm:$0xf0]  ;;  %v916_v59 = vld [vmem:[%s1383_s1 + $0x194] sm:$0xf]  ;;  %v685_v1 = vor.u32 %v884_v53, %v682_v56  ;;  %v610_v4 = vld [vmem:[%s1383_s1 + $0x8] sm:$0xf0] }
  0x2c   :  { %497 = vmatpush.bf16.msrb.mxu0 %v653_v12  ;;  %v810_v60 = vld [vmem:[%s1383_s1 + $0x198] sm:$0xf0]  ;;  %v749_v2 = vor.u32 %v900_v57, %v746_v58  ;;  %v882_v5 = vld [vmem:[%s1383_s1 + $0x84] sm:$0xf]  ;;  %v674_v7 = vld [vmem:[%s1383_s1 + $0x88] sm:$0xf0]  ;;  %v613_v12 = vor.u32 %v866_v3, %v610_v4 }
  0x2d   :  { %511 = vmatpush.bf16.msrb.mxu1 %v717_v13  ;;  %v813_v6 = vor.u32 %v916_v59, %v810_v60  ;;  %v898_v8 = vld [vmem:[%s1383_s1 + $0x104] sm:$0xf]  ;;  %v738_v9 = vld [vmem:[%s1383_s1 + $0x108] sm:$0xf0]  ;;  %v677_v13 = vor.u32 %v882_v5, %v674_v7 }
  0x2e   :  { %525 = vmatpush.bf16.msrb.mxu2 %v781_v14  ;;  %v914_v10 = vld [vmem:[%s1383_s1 + $0x184] sm:$0xf]  ;;  %v802_v11 = vld [vmem:[%s1383_s1 + $0x188] sm:$0xf0]  ;;  %v741_v14 = vor.u32 %v898_v8, %v738_v9 }
  0x2f   :  { %539 = vmatpush.bf16.msrb.mxu3 %v845_v18  ;;  %v805_v15 = vor.u32 %v914_v10, %v802_v11 }
  0x30   :  { %498 = vmatpush.bf16.msrb.mxu0 %v645_v24 }
  0x31   :  { %512 = vmatpush.bf16.msrb.mxu1 %v709_v25 }
  0x32   :  { %526 = vmatpush.bf16.msrb.mxu2 %v773_v26 }
  0x33   :  { %540 = vmatpush.bf16.msrb.mxu3 %v837_v30 }
  0x34   :  { %499 = vmatpush.bf16.msrb.mxu0 %v637_v36 }
  0x35   :  { %513 = vmatpush.bf16.msrb.mxu1 %v701_v37 }
  0x36   :  { %527 = vmatpush.bf16.msrb.mxu2 %v765_v38 }
  0x37   :  { %541 = vmatpush.bf16.msrb.mxu3 %v829_v42 }
  0x38   :  { %500 = vmatpush.bf16.msrb.mxu0 %v629_v48 }
  0x39   :  { %514 = vmatpush.bf16.msrb.mxu1 %v693_v49 }
  0x3a   :  { %528 = vmatpush.bf16.msrb.mxu2 %v757_v50 }
  0x3b   :  { %542 = vmatpush.bf16.msrb.mxu3 %v821_v54 }
  0x3c   :  { %501 = vmatpush.bf16.msrb.mxu0 %v621_v63 }
  0x3d   :  { %515 = vmatpush.bf16.msrb.mxu1 %v685_v1 }
  0x3e   :  { %529 = vmatpush.bf16.msrb.mxu2 %v749_v2 }
  0x3f   :  { %543 = vmatpush.bf16.msrb.mxu3 %v813_v6 }
  0x40   :  { %502 = vmatpush.bf16.msrb.mxu0 %v613_v12 }
  0x41   :  { %516 = vmatpush.bf16.msrb.mxu1 %v677_v13 }
  0x42   :  { %530 = vmatpush.bf16.msrb.mxu2 %v741_v14 }
  0x43   :  { %544 = vmatpush.bf16.msrb.mxu3 %v805_v15  ;;  %503 = vmatmul.bf16.vlgmr.msrb.gmra.mxu0 %v1218_v62  ;;  %v566_v62 = vld [vmem:[%s1385_s2] sm:$0x3] }
  0x44   :  { %517 = vmatmul.bf16.vlgmr.msrb.gmra.mxu1 %v1220_v0  ;;  %v568_v28 = vperm.slane %v566_v62, 0  ;;  %v569_v32 = vperm.slane %v566_v62, 1 }
  0x45   :  { %531 = vmatmul.bf16.vlgmr.msrb.gmra.mxu2 %v1199_v55 }
  0x46   :  { %545 = vmatmul.bf16.vlgmr.msrb.gmra.mxu3 %v1216_v61 }
  0xa0   :  { %v448_v16 = vpop.f32.mrf.mxu0 }
  0xa1   :  { %v462_v17 = vpop.f32.mrf.mxu1 }
  0xa2   :  { %v463_v22 = vadd.f32 %v462_v17, %v448_v16 }
  0xa8   :  { %v476_v18 = vpop.f32.mrf.mxu2  ;;  %v450_v20 = vpop.f32.mrf.mxu0 }
  0xa9   :  { %v490_v19 = vpop.f32.mrf.mxu3  ;;  %v464_v21 = vpop.f32.mrf.mxu1  ;;  %v477_v27 = vadd.f32 %v476_v18, %v463_v22 }
  0xaa   :  { %v465_v61 = vadd.f32 %v464_v21, %v450_v20 }
  0xab   :  { %v491_v55 = vadd.f32 %v490_v19, %v477_v27 }
  0xad   :  { %v572_v33 = vadd.f32 %v568_v28, %v491_v55 }
  0xaf   :  { %v576_v39 = vmax.f32 %v572_v33, 0.0 }
  0xb0   :  { %v478_v23 = vpop.f32.mrf.mxu2 }
  0xb1   :  { %v492_v24 = vpop.f32.mrf.mxu3  ;;  %v479_v34 = vadd.f32 %v478_v23, %v465_v61 }
  0xb3   :  { %v493_v40 = vadd.f32 %v492_v24, %v479_v34 }
  0xb5   :  { %v574_v47 = vadd.f32 %v568_v28, %v493_v40 }
  0xb7   :  { %v578_v50 = vmax.f32 %v574_v47, 0.0 }
  0xc0   :  { %v504_v25 = vpop.f32.mrf.mxu0 }
  0xc1   :  { %v518_v26 = vpop.f32.mrf.mxu1 }
  0xc2   :  { %v519_v0 = vadd.f32 %v518_v26, %v504_v25 }
  0xc8   :  { %v532_v29 = vpop.f32.mrf.mxu2  ;;  %v506_v36 = vpop.f32.mrf.mxu0 }
  0xc9   :  { %v533_v30 = vadd.f32 %v532_v29, %v519_v0  ;;  %v546_v31 = vpop.f32.mrf.mxu3  ;;  %v520_v37 = vpop.f32.mrf.mxu1 }
  0xca   :  { %v521_v42 = vadd.f32 %v520_v37, %v506_v36 }
  0xcb   :  { %v547_v35 = vadd.f32 %v546_v31, %v533_v30 }
  0xcd   :  { %v573_v38 = vadd.f32 %v569_v32, %v547_v35 }
  0xcf   :  { %v577_v41 = vmax.f32 %v573_v38, 0.0 }
  0xd0   :  { %v534_v43 = vpop.f32.mrf.mxu2 }
  0xd1   :  { %v580_v44 = vpack.c.bf16 %v577_v41, %v576_v39  ;;  %v535_v45 = vadd.f32 %v534_v43, %v521_v42  ;;  %v548_v46 = vpop.f32.mrf.mxu3 }
  0xd3   :  { %582 = vst [vmem:[%s1386_s3] sm:$0xff] %v580_v44  ;;  %v549_v48 = vadd.f32 %v548_v46, %v535_v45 }
  0xd5   :  { %v575_v49 = vadd.f32 %v569_v32, %v549_v48 }
  0xd7   :  { %v579_v51 = vmax.f32 %v575_v49, 0.0 }
  0xd9   :  { %v581_v52 = vpack.c.bf16 %v579_v51, %v578_v50 }
  0xdb   :  { %583 = vst [vmem:[%s1386_s3 + $0x8] sm:$0xff] %v581_v52 }

// kernel: fast0tag_forward.5
= control target key start
LH: loop header
LB: loop body
LE: loop exit
PB: predicated region body
PF: predicated region fallthrough
CT: control target
= control target key end

     0   :  { %s1387_s1 = inlined_call_operand.vmem [shape: bf16[256,512], index: 1, kind: input, shape index: {}]   ;;  %s1388_s0 = inlined_call_operand.vmem [shape: bf16[16,256], index: 0, kind: input, shape index: {}]   ;;  %s1389_s2 = inlined_call_operand.vmem [shape: f32[1,512], index: 2, kind: input, shape index: {}]   ;;  %s1390_s3 = inlined_call_operand.vmem [shape: bf16[16,512], index: 3, kind: output, shape index: {}]  }
   0x1   :  { %v736_v0 = vld [vmem:[%s1387_s1 + $0xe0] sm:$0xf]  ;;  %v910_v1 = vld [vmem:[%s1387_s1 + $0xec] sm:$0xf0]  ;;  %v908_v5 = vld [vmem:[%s1387_s1 + $0xe4] sm:$0xf] }
   0x2   :  { %v864_v2 = vld [vmem:[%s1387_s1 + $0x1e0] sm:$0xf]  ;;  %v737_v3 = vor.u32 %v910_v1, %v736_v0  ;;  %v942_v4 = vld [vmem:[%s1387_s1 + $0x1ec] sm:$0xf0]  ;;  %v738_v6 = vld [vmem:[%s1387_s1 + $0xf0] sm:$0xf0] }
   0x3   :  { %v865_v7 = vor.u32 %v942_v4, %v864_v2  ;;  %v741_v8 = vor.u32 %v908_v5, %v738_v6  ;;  %v940_v9 = vld [vmem:[%s1387_s1 + $0x1e4] sm:$0xf]  ;;  %v866_v10 = vld [vmem:[%s1387_s1 + $0x1f0] sm:$0xf0]  ;;  %v720_v11 = vld [vmem:[%s1387_s1 + $0xc0] sm:$0xf] }
   0x4   :  { %435 = vmatpush.bf16.msra.mxu0 %v737_v3  ;;  %v869_v12 = vor.u32 %v940_v9, %v866_v10  ;;  %v906_v13 = vld [vmem:[%s1387_s1 + $0xcc] sm:$0xf0]  ;;  %v848_v14 = vld [vmem:[%s1387_s1 + $0x1c0] sm:$0xf]  ;;  %v904_v18 = vld [vmem:[%s1387_s1 + $0xc4] sm:$0xf] }
   0x5   :  { %v938_v15 = vld [vmem:[%s1387_s1 + $0x1cc] sm:$0xf0]  ;;  %449 = vmatpush.bf16.msra.mxu1 %v865_v7  ;;  %463 = vmatpush.bf16.msra.mxu2 %v741_v8  ;;  %v721_v16 = vor.u32 %v906_v13, %v720_v11  ;;  %v722_v19 = vld [vmem:[%s1387_s1 + $0xd0] sm:$0xf0]  ;;  %v936_v20 = vld [vmem:[%s1387_s1 + $0x1c4] sm:$0xf] }
   0x6   :  { %v849_v17 = vor.u32 %v938_v15, %v848_v14  ;;  %477 = vmatpush.bf16.msra.mxu3 %v869_v12  ;;  %v725_v21 = vor.u32 %v904_v18, %v722_v19  ;;  %v850_v22 = vld [vmem:[%s1387_s1 + $0x1d0] sm:$0xf0]  ;;  %v704_v23 = vld [vmem:[%s1387_s1 + $0xa0] sm:$0xf]  ;;  %v902_v24 = vld [vmem:[%s1387_s1 + $0xac] sm:$0xf0] }
   0x7   :  { %v853_v25 = vor.u32 %v936_v20, %v850_v22  ;;  %v832_v26 = vld [vmem:[%s1387_s1 + $0x1a0] sm:$0xf]  ;;  %v934_v27 = vld [vmem:[%s1387_s1 + $0x1ac] sm:$0xf0]  ;;  %v900_v28 = vld [vmem:[%s1387_s1 + $0xa4] sm:$0xf]  ;;  %v705_v29 = vor.u32 %v902_v24, %v704_v23 }
   0x8   :  { %436 = vmatpush.bf16.msra.mxu0 %v721_v16  ;;  %v706_v30 = vld [vmem:[%s1387_s1 + $0xb0] sm:$0xf0]  ;;  %v932_v31 = vld [vmem:[%s1387_s1 + $0x1a4] sm:$0xf]  ;;  %v833_v33 = vor.u32 %v934_v27, %v832_v26  ;;  %v688_v35 = vld [vmem:[%s1387_s1 + $0x80] sm:$0xf] }
   0x9   :  { %v834_v32 = vld [vmem:[%s1387_s1 + $0x1b0] sm:$0xf0]  ;;  %450 = vmatpush.bf16.msra.mxu1 %v849_v17  ;;  %464 = vmatpush.bf16.msra.mxu2 %v725_v21  ;;  %v709_v34 = vor.u32 %v900_v28, %v706_v30  ;;  %v898_v36 = vld [vmem:[%s1387_s1 + $0x8c] sm:$0xf0]  ;;  %v816_v37 = vld [vmem:[%s1387_s1 + $0x180] sm:$0xf] }
   0xa   :  { %478 = vmatpush.bf16.msra.mxu3 %v853_v25  ;;  %v837_v38 = vor.u32 %v932_v31, %v834_v32  ;;  %v930_v39 = vld [vmem:[%s1387_s1 + $0x18c] sm:$0xf0]  ;;  %v896_v40 = vld [vmem:[%s1387_s1 + $0x84] sm:$0xf]  ;;  %v690_v41 = vld [vmem:[%s1387_s1 + $0x90] sm:$0xf0]  ;;  %v689_v44 = vor.u32 %v898_v36, %v688_v35 }
   0xb   :  { %v928_v42 = vld [vmem:[%s1387_s1 + $0x184] sm:$0xf]  ;;  %v818_v43 = vld [vmem:[%s1387_s1 + $0x190] sm:$0xf0]  ;;  %v817_v45 = vor.u32 %v930_v39, %v816_v37  ;;  %v693_v46 = vor.u32 %v896_v40, %v690_v41  ;;  %v672_v47 = vld [vmem:[%s1387_s1 + $0x60] sm:$0xf] }
   0xc   :  { %437 = vmatpush.bf16.msra.mxu0 %v705_v29  ;;  %v894_v48 = vld [vmem:[%s1387_s1 + $0x6c] sm:$0xf0]  ;;  %v800_v49 = vld [vmem:[%s1387_s1 + $0x160] sm:$0xf]  ;;  %v821_v50 = vor.u32 %v928_v42, %v818_v43  ;;  %v892_v52 = vld [vmem:[%s1387_s1 + $0x64] sm:$0xf] }
   0xd   :  { %451 = vmatpush.bf16.msra.mxu1 %v833_v33  ;;  %465 = vmatpush.bf16.msra.mxu2 %v709_v34  ;;  %v926_v51 = vld [vmem:[%s1387_s1 + $0x16c] sm:$0xf0]  ;;  %v674_v53 = vld [vmem:[%s1387_s1 + $0x70] sm:$0xf0]  ;;  %v924_v54 = vld [vmem:[%s1387_s1 + $0x164] sm:$0xf]  ;;  %v673_v56 = vor.u32 %v894_v48, %v672_v47 }
   0xe   :  { %479 = vmatpush.bf16.msra.mxu3 %v837_v38  ;;  %v802_v55 = vld [vmem:[%s1387_s1 + $0x170] sm:$0xf0]  ;;  %v801_v57 = vor.u32 %v926_v51, %v800_v49  ;;  %v677_v58 = vor.u32 %v892_v52, %v674_v53  ;;  %v656_v59 = vld [vmem:[%s1387_s1 + $0x40] sm:$0xf]  ;;  %v890_v60 = vld [vmem:[%s1387_s1 + $0x4c] sm:$0xf0] }
   0xf   :  { %v784_v61 = vld [vmem:[%s1387_s1 + $0x140] sm:$0xf]  ;;  %v805_v62 = vor.u32 %v924_v54, %v802_v55  ;;  %v922_v63 = vld [vmem:[%s1387_s1 + $0x14c] sm:$0xf0]  ;;  %v888_v0 = vld [vmem:[%s1387_s1 + $0x44] sm:$0xf]  ;;  %v657_v4 = vor.u32 %v890_v60, %v656_v59 }
  0x10   :  { %438 = vmatpush.bf16.msra.mxu0 %v689_v44  ;;  %v658_v1 = vld [vmem:[%s1387_s1 + $0x50] sm:$0xf0]  ;;  %v920_v2 = vld [vmem:[%s1387_s1 + $0x144] sm:$0xf]  ;;  %v785_v5 = vor.u32 %v922_v63, %v784_v61  ;;  %v640_v7 = vld [vmem:[%s1387_s1 + $0x20] sm:$0xf] }
  0x11   :  { %452 = vmatpush.bf16.msra.mxu1 %v817_v45  ;;  %466 = vmatpush.bf16.msra.mxu2 %v693_v46  ;;  %v786_v3 = vld [vmem:[%s1387_s1 + $0x150] sm:$0xf0]  ;;  %v661_v6 = vor.u32 %v888_v0, %v658_v1  ;;  %v886_v8 = vld [vmem:[%s1387_s1 + $0x2c] sm:$0xf0]  ;;  %v768_v9 = vld [vmem:[%s1387_s1 + $0x120] sm:$0xf] }
  0x12   :  { %480 = vmatpush.bf16.msra.mxu3 %v821_v50  ;;  %v789_v10 = vor.u32 %v920_v2, %v786_v3  ;;  %v918_v11 = vld [vmem:[%s1387_s1 + $0x12c] sm:$0xf0]  ;;  %v884_v12 = vld [vmem:[%s1387_s1 + $0x24] sm:$0xf]  ;;  %v642_v13 = vld [vmem:[%s1387_s1 + $0x30] sm:$0xf0]  ;;  %v641_v16 = vor.u32 %v886_v8, %v640_v7 }
  0x13   :  { %v916_v14 = vld [vmem:[%s1387_s1 + $0x124] sm:$0xf]  ;;  %v770_v15 = vld [vmem:[%s1387_s1 + $0x130] sm:$0xf0]  ;;  %v624_v17 = vld [vmem:[%s1387_s1] sm:$0xf]  ;;  %v769_v20 = vor.u32 %v918_v11, %v768_v9  ;;  %v645_v21 = vor.u32 %v884_v12, %v642_v13 }
  0x14   :  { %439 = vmatpush.bf16.msra.mxu0 %v673_v56  ;;  %v882_v18 = vld [vmem:[%s1387_s1 + $0xc] sm:$0xf0]  ;;  %v752_v19 = vld [vmem:[%s1387_s1 + $0x100] sm:$0xf]  ;;  %v880_v23 = vld [vmem:[%s1387_s1 + $0x4] sm:$0xf]  ;;  %v773_v25 = vor.u32 %v916_v14, %v770_v15 }
  0x15   :  { %453 = vmatpush.bf16.msra.mxu1 %v801_v57  ;;  %467 = vmatpush.bf16.msra.mxu2 %v677_v58  ;;  %v914_v22 = vld [vmem:[%s1387_s1 + $0x10c] sm:$0xf0]  ;;  %v626_v24 = vld [vmem:[%s1387_s1 + $0x10] sm:$0xf0]  ;;  %v912_v26 = vld [vmem:[%s1387_s1 + $0x104] sm:$0xf]  ;;  %v625_v32 = vor.u32 %v882_v18, %v624_v17 }
  0x16   :  { %481 = vmatpush.bf16.msra.mxu3 %v805_v62  ;;  %v754_v27 = vld [vmem:[%s1387_s1 + $0x110] sm:$0xf0]  ;;  %v744_v28 = vld [vmem:[%s1387_s1 + $0xe8] sm:$0xf]  ;;  %v911_v29 = vld [vmem:[%s1387_s1 + $0xf4] sm:$0xf0]  ;;  %v753_v36 = vor.u32 %v914_v22, %v752_v19  ;;  %v629_v37 = vor.u32 %v880_v23, %v626_v24 }
  0x17   :  { %v872_v30 = vld [vmem:[%s1387_s1 + $0x1e8] sm:$0xf]  ;;  %v943_v31 = vld [vmem:[%s1387_s1 + $0x1f4] sm:$0xf0]  ;;  %v909_v33 = vld [vmem:[%s1387_s1 + $0xec] sm:$0xf]  ;;  %v757_v41 = vor.u32 %v912_v26, %v754_v27  ;;  %v745_v42 = vor.u32 %v911_v29, %v744_v28 }
  0x18   :  { %440 = vmatpush.bf16.msra.mxu0 %v657_v4  ;;  %v746_v34 = vld [vmem:[%s1387_s1 + $0xf8] sm:$0xf0]  ;;  %v941_v35 = vld [vmem:[%s1387_s1 + $0x1ec] sm:$0xf]  ;;  %v616_v39 = vld [vmem:[%s1388_s0] sm:$0xf]  ;;  %v873_v45 = vor.u32 %v943_v31, %v872_v30 }
  0x19   :  { %454 = vmatpush.bf16.msra.mxu1 %v785_v5  ;;  %468 = vmatpush.bf16.msra.mxu2 %v661_v6  ;;  %v874_v38 = vld [vmem:[%s1387_s1 + $0x1f8] sm:$0xf0]  ;;  %v879_v40 = vld [vmem:[%s1388_s0 + $0x4] sm:$0xf0]  ;;  %v878_v43 = vld [vmem:[%s1388_s0 + $0x4] sm:$0xf]  ;;  %v749_v46 = vor.u32 %v909_v33, %v746_v34 }
  0x1a   :  { %482 = vmatpush.bf16.msra.mxu3 %v789_v10  ;;  %v618_v44 = vld [vmem:[%s1388_s0 + $0x8] sm:$0xf0]  ;;  %v728_v47 = vld [vmem:[%s1387_s1 + $0xc8] sm:$0xf]  ;;  %v907_v48 = vld [vmem:[%s1387_s1 + $0xd4] sm:$0xf0]  ;;  %v877_v50 = vor.u32 %v941_v35, %v874_v38  ;;  %v1210_v54 = vor.u32 %v879_v40, %v616_v39 }
  0x1b   :  { %v856_v49 = vld [vmem:[%s1387_s1 + $0x1c8] sm:$0xf]  ;;  %v939_v51 = vld [vmem:[%s1387_s1 + $0x1d4] sm:$0xf0]  ;;  %v905_v52 = vld [vmem:[%s1387_s1 + $0xcc] sm:$0xf]  ;;  %v1218_v57 = vor.u32 %v878_v43, %v618_v44  ;;  %v729_v58 = vor.u32 %v907_v48, %v728_v47 }
  0x1c   :  { %441 = vmatpush.bf16.msra.mxu0 %v641_v16  ;;  %v730_v53 = vld [vmem:[%s1387_s1 + $0xd8] sm:$0xf0]  ;;  %v937_v55 = vld [vmem:[%s1387_s1 + $0x1cc] sm:$0xf]  ;;  %v857_v59 = vor.u32 %v939_v51, %v856_v49  ;;  %v712_v61 = vld [vmem:[%s1387_s1 + $0xa8] sm:$0xf] }
  0x1d   :  { %455 = vmatpush.bf16.msra.mxu1 %v769_v20  ;;  %469 = vmatpush.bf16.msra.mxu2 %v645_v21  ;;  %v858_v56 = vld [vmem:[%s1387_s1 + $0x1d8] sm:$0xf0]  ;;  %v733_v60 = vor.u32 %v905_v52, %v730_v53  ;;  %v903_v62 = vld [vmem:[%s1387_s1 + $0xb4] sm:$0xf0]  ;;  %v840_v63 = vld [vmem:[%s1387_s1 + $0x1a8] sm:$0xf] }
  0x1e   :  { %483 = vmatpush.bf16.msra.mxu3 %v773_v25  ;;  %v861_v0 = vor.u32 %v937_v55, %v858_v56  ;;  %v935_v1 = vld [vmem:[%s1387_s1 + $0x1b4] sm:$0xf0]  ;;  %v901_v2 = vld [vmem:[%s1387_s1 + $0xac] sm:$0xf]  ;;  %v714_v3 = vld [vmem:[%s1387_s1 + $0xb8] sm:$0xf0]  ;;  %v713_v6 = vor.u32 %v903_v62, %v712_v61 }
  0x1f   :  { %v933_v4 = vld [vmem:[%s1387_s1 + $0x1ac] sm:$0xf]  ;;  %v842_v5 = vld [vmem:[%s1387_s1 + $0x1b8] sm:$0xf0]  ;;  %v841_v7 = vor.u32 %v935_v1, %v840_v63  ;;  %v717_v8 = vor.u32 %v901_v2, %v714_v3  ;;  %v696_v9 = vld [vmem:[%s1387_s1 + $0x88] sm:$0xf] }
  0x20   :  { %442 = vmatpush.bf16.msra.mxu0 %v625_v32  ;;  %v899_v10 = vld [vmem:[%s1387_s1 + $0x94] sm:$0xf0]  ;;  %v824_v11 = vld [vmem:[%s1387_s1 + $0x188] sm:$0xf]  ;;  %v845_v12 = vor.u32 %v933_v4, %v842_v5  ;;  %v897_v14 = vld [vmem:[%s1387_s1 + $0x8c] sm:$0xf] }
  0x21   :  { %456 = vmatpush.bf16.msra.mxu1 %v753_v36  ;;  %470 = vmatpush.bf16.msra.mxu2 %v629_v37  ;;  %v931_v13 = vld [vmem:[%s1387_s1 + $0x194] sm:$0xf0]  ;;  %v698_v15 = vld [vmem:[%s1387_s1 + $0x98] sm:$0xf0]  ;;  %v929_v16 = vld [vmem:[%s1387_s1 + $0x18c] sm:$0xf]  ;;  %v697_v18 = vor.u32 %v899_v10, %v696_v9 }
  0x22   :  { %484 = vmatpush.bf16.msra.mxu3 %v757_v41  ;;  %v826_v17 = vld [vmem:[%s1387_s1 + $0x198] sm:$0xf0]  ;;  %v825_v19 = vor.u32 %v931_v13, %v824_v11  ;;  %v701_v20 = vor.u32 %v897_v14, %v698_v15  ;;  %v680_v21 = vld [vmem:[%s1387_s1 + $0x68] sm:$0xf]  ;;  %v895_v22 = vld [vmem:[%s1387_s1 + $0x74] sm:$0xf0] }
  0x23   :  { %443 = vmatmul.bf16.vlgmr.msra.gmra.mxu0 %v1210_v54  ;;  %v808_v23 = vld [vmem:[%s1387_s1 + $0x168] sm:$0xf]  ;;  %v829_v24 = vor.u32 %v929_v16, %v826_v17  ;;  %v927_v25 = vld [vmem:[%s1387_s1 + $0x174] sm:$0xf0]  ;;  %v893_v26 = vld [vmem:[%s1387_s1 + $0x6c] sm:$0xf]  ;;  %v681_v30 = vor.u32 %v895_v22, %v680_v21 }
  0x24   :  { %491 = vmatpush.bf16.msrb.mxu0 %v745_v42  ;;  %471 = vmatmul.bf16.vlgmr.msra.gmra.mxu2 %v1210_v54  ;;  %v682_v27 = vld [vmem:[%s1387_s1 + $0x78] sm:$0xf0]  ;;  %v925_v28 = vld [vmem:[%s1387_s1 + $0x16c] sm:$0xf]  ;;  %v809_v31 = vor.u32 %v927_v25, %v808_v23  ;;  %v664_v33 = vld [vmem:[%s1387_s1 + $0x48] sm:$0xf] }
  0x25   :  { %505 = vmatpush.bf16.msrb.mxu1 %v873_v45  ;;  %519 = vmatpush.bf16.msrb.mxu2 %v749_v46  ;;  %v810_v29 = vld [vmem:[%s1387_s1 + $0x178] sm:$0xf0]  ;;  %v685_v32 = vor.u32 %v893_v26, %v682_v27  ;;  %v891_v34 = vld [vmem:[%s1387_s1 + $0x54] sm:$0xf0]  ;;  %v792_v35 = vld [vmem:[%s1387_s1 + $0x148] sm:$0xf] }
  0x26   :  { %533 = vmatpush.bf16.msrb.mxu3 %v877_v50  ;;  %457 = vmatmul.bf16.vlgmr.msra.gmra.mxu1 %v1218_v57  ;;  %v813_v36 = vor.u32 %v925_v28, %v810_v29  ;;  %v923_v37 = vld [vmem:[%s1387_s1 + $0x154] sm:$0xf0]  ;;  %v889_v38 = vld [vmem:[%s1387_s1 + $0x4c] sm:$0xf]  ;;  %v666_v39 = vld [vmem:[%s1387_s1 + $0x58] sm:$0xf0]  ;;  %v665_v42 = vor.u32 %v891_v34, %v664_v33 }
  0x27   :  { %485 = vmatmul.bf16.vlgmr.msra.gmra.mxu3 %v1218_v57  ;;  %v921_v40 = vld [vmem:[%s1387_s1 + $0x14c] sm:$0xf]  ;;  %v794_v41 = vld [vmem:[%s1387_s1 + $0x158] sm:$0xf0]  ;;  %v793_v43 = vor.u32 %v923_v37, %v792_v35  ;;  %v669_v44 = vor.u32 %v889_v38, %v666_v39  ;;  %v648_v45 = vld [vmem:[%s1387_s1 + $0x28] sm:$0xf] }
  0x28   :  { %492 = vmatpush.bf16.msrb.mxu0 %v729_v58  ;;  %v887_v46 = vld [vmem:[%s1387_s1 + $0x34] sm:$0xf0]  ;;  %v776_v47 = vld [vmem:[%s1387_s1 + $0x128] sm:$0xf]  ;;  %v797_v48 = vor.u32 %v921_v40, %v794_v41  ;;  %v885_v50 = vld [vmem:[%s1387_s1 + $0x2c] sm:$0xf] }
  0x29   :  { %506 = vmatpush.bf16.msrb.mxu1 %v857_v59  ;;  %520 = vmatpush.bf16.msrb.mxu2 %v733_v60  ;;  %v919_v49 = vld [vmem:[%s1387_s1 + $0x134] sm:$0xf0]  ;;  %v650_v51 = vld [vmem:[%s1387_s1 + $0x38] sm:$0xf0]  ;;  %v917_v52 = vld [vmem:[%s1387_s1 + $0x12c] sm:$0xf]  ;;  %v649_v55 = vor.u32 %v887_v46, %v648_v45 }
  0x2a   :  { %534 = vmatpush.bf16.msrb.mxu3 %v861_v0  ;;  %v778_v53 = vld [vmem:[%s1387_s1 + $0x138] sm:$0xf0]  ;;  %v777_v56 = vor.u32 %v919_v49, %v776_v47  ;;  %v653_v58 = vor.u32 %v885_v50, %v650_v51  ;;  %v632_v59 = vld [vmem:[%s1387_s1 + $0x8] sm:$0xf]  ;;  %v883_v60 = vld [vmem:[%s1387_s1 + $0x14] sm:$0xf0] }
  0x2b   :  { %v760_v61 = vld [vmem:[%s1387_s1 + $0x108] sm:$0xf]  ;;  %v781_v62 = vor.u32 %v917_v52, %v778_v53  ;;  %v915_v63 = vld [vmem:[%s1387_s1 + $0x114] sm:$0xf0]  ;;  %v881_v0 = vld [vmem:[%s1387_s1 + $0xc] sm:$0xf]  ;;  %v633_v4 = vor.u32 %v883_v60, %v632_v59 }
  0x2c   :  { %493 = vmatpush.bf16.msrb.mxu0 %v713_v6  ;;  %v634_v1 = vld [vmem:[%s1387_s1 + $0x18] sm:$0xf0]  ;;  %v913_v2 = vld [vmem:[%s1387_s1 + $0x10c] sm:$0xf]  ;;  %v761_v5 = vor.u32 %v915_v63, %v760_v61 }
  0x2d   :  { %507 = vmatpush.bf16.msrb.mxu1 %v841_v7  ;;  %521 = vmatpush.bf16.msrb.mxu2 %v717_v8  ;;  %v762_v3 = vld [vmem:[%s1387_s1 + $0x118] sm:$0xf0]  ;;  %v637_v6 = vor.u32 %v881_v0, %v634_v1  ;;  %v574_v8 = vld [vmem:[%s1389_s2] sm:$0xf] }
  0x2e   :  { %535 = vmatpush.bf16.msrb.mxu3 %v845_v12  ;;  %v765_v7 = vor.u32 %v913_v2, %v762_v3  ;;  %v576_v11 = vperm.slane %v574_v8, 0  ;;  %v577_v15 = vperm.slane %v574_v8, 1  ;;  %v578_v34 = vperm.slane %v574_v8, 2 }
  0x2f   :  { %v579_v37 = vperm.slane %v574_v8, 3 }
  0x30   :  { %494 = vmatpush.bf16.msrb.mxu0 %v697_v18 }
  0x31   :  { %508 = vmatpush.bf16.msrb.mxu1 %v825_v19  ;;  %522 = vmatpush.bf16.msrb.mxu2 %v701_v20 }
  0x32   :  { %536 = vmatpush.bf16.msrb.mxu3 %v829_v24 }
  0x34   :  { %495 = vmatpush.bf16.msrb.mxu0 %v681_v30 }
  0x35   :  { %509 = vmatpush.bf16.msrb.mxu1 %v809_v31  ;;  %523 = vmatpush.bf16.msrb.mxu2 %v685_v32 }
  0x36   :  { %537 = vmatpush.bf16.msrb.mxu3 %v813_v36 }
  0x38   :  { %496 = vmatpush.bf16.msrb.mxu0 %v665_v42 }
  0x39   :  { %510 = vmatpush.bf16.msrb.mxu1 %v793_v43  ;;  %524 = vmatpush.bf16.msrb.mxu2 %v669_v44 }
  0x3a   :  { %538 = vmatpush.bf16.msrb.mxu3 %v797_v48 }
  0x3c   :  { %497 = vmatpush.bf16.msrb.mxu0 %v649_v55 }
  0x3d   :  { %511 = vmatpush.bf16.msrb.mxu1 %v777_v56  ;;  %525 = vmatpush.bf16.msrb.mxu2 %v653_v58 }
  0x3e   :  { %539 = vmatpush.bf16.msrb.mxu3 %v781_v62 }
  0x40   :  { %498 = vmatpush.bf16.msrb.mxu0 %v633_v4 }
  0x41   :  { %512 = vmatpush.bf16.msrb.mxu1 %v761_v5  ;;  %526 = vmatpush.bf16.msrb.mxu2 %v637_v6 }
  0x42   :  { %540 = vmatpush.bf16.msrb.mxu3 %v765_v7 }
  0x43   :  { %499 = vmatmul.bf16.vlgmr.msrb.gmra.mxu0 %v1210_v54 }
  0x44   :  { %513 = vmatmul.bf16.vlgmr.msrb.gmra.mxu1 %v1218_v57  ;;  %527 = vmatmul.bf16.vlgmr.msrb.gmra.mxu2 %v1210_v54 }
  0x45   :  { %541 = vmatmul.bf16.vlgmr.msrb.gmra.mxu3 %v1218_v57 }
  0xa0   :  { %v444_v9 = vpop.f32.mrf.mxu0 }
  0xa3   :  { %v458_v10 = vpop.f32.mrf.mxu1 }
  0xa4   :  { %v459_v12 = vadd.f32 %v458_v10, %v444_v9 }
  0xa6   :  { %v584_v13 = vadd.f32 %v576_v11, %v459_v12 }
  0xa7   :  { %v472_v14 = vpop.f32.mrf.mxu2 }
  0xa8   :  { %v446_v18 = vpop.f32.mrf.mxu0  ;;  %v592_v19 = vmax.f32 %v584_v13, 0.0 }
  0xaa   :  { %v486_v16 = vpop.f32.mrf.mxu3 }
  0xab   :  { %v487_v17 = vadd.f32 %v486_v16, %v472_v14  ;;  %v460_v21 = vpop.f32.mrf.mxu1 }
  0xac   :  { %v461_v54 = vadd.f32 %v460_v21, %v446_v18 }
  0xad   :  { %v585_v20 = vadd.f32 %v577_v15, %v487_v17 }
  0xae   :  { %v588_v23 = vadd.f32 %v576_v11, %v461_v54 }
  0xaf   :  { %v593_v22 = vmax.f32 %v585_v20, 0.0  ;;  %v474_v24 = vpop.f32.mrf.mxu2 }
  0xb0   :  { %v596_v27 = vmax.f32 %v588_v23, 0.0 }
  0xb1   :  { %v600_v57 = vpack.c.bf16 %v593_v22, %v592_v19 }
  0xb2   :  { %v488_v25 = vpop.f32.mrf.mxu3 }
  0xb3   :  { %604 = vst [vmem:[%s1390_s3] sm:$0xff] %v600_v57  ;;  %v489_v26 = vadd.f32 %v488_v25, %v474_v24 }
  0xb5   :  { %v589_v28 = vadd.f32 %v577_v15, %v489_v26 }
  0xb7   :  { %v597_v29 = vmax.f32 %v589_v28, 0.0 }
  0xb9   :  { %v602_v30 = vpack.c.bf16 %v597_v29, %v596_v27 }
  0xbb   :  { %606 = vst [vmem:[%s1390_s3 + $0x10] sm:$0xff] %v602_v30 }
  0xc0   :  { %v500_v31 = vpop.f32.mrf.mxu0 }
  0xc1   :  { %v514_v32 = vpop.f32.mrf.mxu1 }
  0xc2   :  { %v515_v33 = vadd.f32 %v514_v32, %v500_v31 }
  0xc4   :  { %v586_v35 = vadd.f32 %v578_v34, %v515_v33 }
  0xc6   :  { %v594_v42 = vmax.f32 %v586_v35, 0.0 }
  0xc7   :  { %v528_v36 = vpop.f32.mrf.mxu2 }
  0xc8   :  { %v542_v38 = vpop.f32.mrf.mxu3  ;;  %v502_v40 = vpop.f32.mrf.mxu0 }
  0xc9   :  { %v543_v39 = vadd.f32 %v542_v38, %v528_v36  ;;  %v516_v41 = vpop.f32.mrf.mxu1 }
  0xca   :  { %v517_v45 = vadd.f32 %v516_v41, %v502_v40 }
  0xcb   :  { %v587_v43 = vadd.f32 %v579_v37, %v543_v39 }
  0xcc   :  { %v590_v49 = vadd.f32 %v578_v34, %v517_v45 }
  0xcd   :  { %v595_v44 = vmax.f32 %v587_v43, 0.0 }
  0xce   :  { %v598_v52 = vmax.f32 %v590_v49, 0.0 }
  0xcf   :  { %v601_v46 = vpack.c.bf16 %v595_v44, %v594_v42  ;;  %v530_v47 = vpop.f32.mrf.mxu2 }
  0xd0   :  { %v544_v48 = vpop.f32.mrf.mxu3 }
  0xd1   :  { %605 = vst [vmem:[%s1390_s3 + $0x8] sm:$0xff] %v601_v46  ;;  %v545_v50 = vadd.f32 %v544_v48, %v530_v47 }
  0xd3   :  { %v591_v51 = vadd.f32 %v579_v37, %v545_v50 }
  0xd5   :  { %v599_v53 = vmax.f32 %v591_v51, 0.0 }
  0xd7   :  { %v603_v55 = vpack.c.bf16 %v599_v53, %v598_v52 }
  0xd9   :  { %607 = vst [vmem:[%s1390_s3 + $0x18] sm:$0xff] %v603_v55 }

// kernel: fast0tag_forward.7
= control target key start
LH: loop header
LB: loop body
LE: loop exit
PB: predicated region body
PF: predicated region fallthrough
CT: control target
= control target key end

     0   :  { %11 = vsyncpa [#allocation4], 0  ;;  %s1570_s0 = inlined_call_operand.vmem [shape: bf16[16,256], index: 0, kind: input, shape index: {}]   ;;  %s1571_s1 = inlined_call_operand.hbm [shape: bf16[256,384], index: 1, kind: input, shape index: {}]   ;;  %s1572_s2 = inlined_call_operand.vmem [shape: f32[1,384], index: 2, kind: input, shape index: {}]   ;;  %s1573_s3 = inlined_call_operand.hbm [shape: bf16[384,256], index: 3, kind: input, shape index: {}]   ;;  %s1574_s4 = inlined_call_operand.vmem [shape: f32[1,16,384], index: 4, kind: output, shape index: {0}]   ;;  %s1575_s5 = inlined_call_operand.vmem [shape: f32[16,256], index: 5, kind: output, shape index: {1}]  }
   0x1   :  { %s19_s20 = sshll.u32 %s1571_s1, 4  ;;  %s20_s20 = int_to_ptr.hbm [resolvable:$true] %s19_s20 }
   0x2   :  { %12 = vsyncpa [#allocation6], 0  ;;  %s1468_s21 = smov [#allocation3]   ;;  %s34_s25 = sshll.u32 %s1573_s3, 4  ;;  %s35_s25 = int_to_ptr.hbm [resolvable:$true] %s34_s25 }
   0x3   :  { %s21_s22 = sshll.u32 %s1468_s21, 4  ;;  %s1469_s26 = smov 192   ;;  %s22_s22 = int_to_ptr.vmem [resolvable:$true] %s21_s22 }
   0x4   :  { %s1470_s27 = smov 12   ;;  %s1471_s28 = smov [#allocation5]  }
   0x5   :  { %27 = dma.hbm_to_vmem [thread:$0]  %s20_s20, 6144, %s22_s22, [#allocation4], %s1469_s26, %s1469_s26, %s1470_s27  }
   0x6   :  { %s36_s29 = sshll.u32 %s1471_s28, 4  ;;  %s1472_s30 = smov 128   ;;  %s37_s29 = int_to_ptr.vmem [resolvable:$true] %s36_s29 }
   0x7   :  { %s1473_s6 = smov 8  }
   0x8   :  { %42 = dma.hbm_to_vmem [thread:$0]  %s35_s25, 6144, %s37_s29, [#allocation6], %s1472_s30, %s1472_s30, %s1473_s6  }
   0x9   :  { %1464 = dma.done.wait [#allocation4], 6144  }
   0xa   :  { %1465 = vsyncadd [#allocation4], 4294961152 }
   0xb   :  { %1466 = dma.done.wait [#allocation6], 6144  }
   0xc   :  { %1467 = vsyncadd [#allocation6], 4294961152  ;;  %v1014_v0 = vld [vmem:[#allocation3 + $0xa8] sm:$0xf]  ;;  %v1336_v1 = vld [vmem:[#allocation3 + $0xb0] sm:$0xf0] }
   0xd   :  { %v1110_v2 = vld [vmem:[#allocation3 + $0x168] sm:$0xf]  ;;  %v1015_v3 = vor.u32 %v1336_v1, %v1014_v0  ;;  %v1360_v4 = vld [vmem:[#allocation3 + $0x170] sm:$0xf0]  ;;  %v1335_v5 = vld [vmem:[#allocation3 + $0xac] sm:$0xf] }
   0xe   :  { %v1016_v6 = vld [vmem:[#allocation3 + $0xb4] sm:$0xf0]  ;;  %v1111_v7 = vor.u32 %v1360_v4, %v1110_v2  ;;  %v1359_v9 = vld [vmem:[#allocation3 + $0x16c] sm:$0xf]  ;;  %v1002_v11 = vld [vmem:[#allocation3 + $0x90] sm:$0xf] }
   0xf   :  { %v1019_v8 = vor.u32 %v1335_v5, %v1016_v6  ;;  %v1112_v10 = vld [vmem:[#allocation3 + $0x174] sm:$0xf0]  ;;  %404 = vmatpush.bf16.msra.mxu0 %v1015_v3  ;;  %v1333_v13 = vld [vmem:[#allocation3 + $0x98] sm:$0xf0]  ;;  %v1098_v14 = vld [vmem:[#allocation3 + $0x150] sm:$0xf] }
  0x10   :  { %v1115_v12 = vor.u32 %v1359_v9, %v1112_v10  ;;  %v1357_v15 = vld [vmem:[#allocation3 + $0x158] sm:$0xf0]  ;;  %418 = vmatpush.bf16.msra.mxu1 %v1111_v7  ;;  %v1003_v16 = vor.u32 %v1333_v13, %v1002_v11  ;;  %v1332_v18 = vld [vmem:[#allocation3 + $0x94] sm:$0xf]  ;;  %v1004_v19 = vld [vmem:[#allocation3 + $0x9c] sm:$0xf0] }
  0x11   :  { %432 = vmatpush.bf16.msra.mxu2 %v1019_v8  ;;  %v1099_v17 = vor.u32 %v1357_v15, %v1098_v14  ;;  %v1356_v20 = vld [vmem:[#allocation3 + $0x154] sm:$0xf]  ;;  %v1007_v21 = vor.u32 %v1332_v18, %v1004_v19  ;;  %v1100_v22 = vld [vmem:[#allocation3 + $0x15c] sm:$0xf0]  ;;  %v990_v23 = vld [vmem:[#allocation3 + $0x78] sm:$0xf] }
  0x12   :  { %446 = vmatpush.bf16.msra.mxu3 %v1115_v12  ;;  %v1330_v24 = vld [vmem:[#allocation3 + $0x80] sm:$0xf0]  ;;  %v1103_v25 = vor.u32 %v1356_v20, %v1100_v22  ;;  %v1086_v26 = vld [vmem:[#allocation3 + $0x138] sm:$0xf]  ;;  %v1329_v28 = vld [vmem:[#allocation3 + $0x7c] sm:$0xf] }
  0x13   :  { %v1354_v27 = vld [vmem:[#allocation3 + $0x140] sm:$0xf0]  ;;  %405 = vmatpush.bf16.msra.mxu0 %v1003_v16  ;;  %v991_v29 = vor.u32 %v1330_v24, %v990_v23  ;;  %v992_v30 = vld [vmem:[#allocation3 + $0x84] sm:$0xf0]  ;;  %v1353_v31 = vld [vmem:[#allocation3 + $0x13c] sm:$0xf] }
  0x14   :  { %v1088_v32 = vld [vmem:[#allocation3 + $0x144] sm:$0xf0]  ;;  %419 = vmatpush.bf16.msra.mxu1 %v1099_v17  ;;  %v1087_v33 = vor.u32 %v1354_v27, %v1086_v26  ;;  %v995_v34 = vor.u32 %v1329_v28, %v992_v30  ;;  %v978_v35 = vld [vmem:[#allocation3 + $0x60] sm:$0xf]  ;;  %v1327_v36 = vld [vmem:[#allocation3 + $0x68] sm:$0xf0] }
  0x15   :  { %433 = vmatpush.bf16.msra.mxu2 %v1007_v21  ;;  %v1074_v37 = vld [vmem:[#allocation3 + $0x120] sm:$0xf]  ;;  %v1091_v38 = vor.u32 %v1353_v31, %v1088_v32  ;;  %v1351_v39 = vld [vmem:[#allocation3 + $0x128] sm:$0xf0]  ;;  %v1326_v40 = vld [vmem:[#allocation3 + $0x64] sm:$0xf]  ;;  %v979_v44 = vor.u32 %v1327_v36, %v978_v35 }
  0x16   :  { %447 = vmatpush.bf16.msra.mxu3 %v1103_v25  ;;  %v980_v41 = vld [vmem:[#allocation3 + $0x6c] sm:$0xf0]  ;;  %v1350_v42 = vld [vmem:[#allocation3 + $0x124] sm:$0xf]  ;;  %v1075_v45 = vor.u32 %v1351_v39, %v1074_v37  ;;  %v966_v47 = vld [vmem:[#allocation3 + $0x48] sm:$0xf] }
  0x17   :  { %v1076_v43 = vld [vmem:[#allocation3 + $0x12c] sm:$0xf0]  ;;  %406 = vmatpush.bf16.msra.mxu0 %v991_v29  ;;  %v983_v46 = vor.u32 %v1326_v40, %v980_v41  ;;  %v1324_v48 = vld [vmem:[#allocation3 + $0x50] sm:$0xf0]  ;;  %v1062_v49 = vld [vmem:[#allocation3 + $0x108] sm:$0xf] }
  0x18   :  { %420 = vmatpush.bf16.msra.mxu1 %v1087_v33  ;;  %v1079_v50 = vor.u32 %v1350_v42, %v1076_v43  ;;  %v1348_v51 = vld [vmem:[#allocation3 + $0x110] sm:$0xf0]  ;;  %v1323_v52 = vld [vmem:[#allocation3 + $0x4c] sm:$0xf]  ;;  %v968_v53 = vld [vmem:[#allocation3 + $0x54] sm:$0xf0]  ;;  %v967_v56 = vor.u32 %v1324_v48, %v966_v47 }
  0x19   :  { %434 = vmatpush.bf16.msra.mxu2 %v995_v34  ;;  %v1347_v54 = vld [vmem:[#allocation3 + $0x10c] sm:$0xf]  ;;  %v1064_v55 = vld [vmem:[#allocation3 + $0x114] sm:$0xf0]  ;;  %v1063_v57 = vor.u32 %v1348_v51, %v1062_v49  ;;  %v971_v58 = vor.u32 %v1323_v52, %v968_v53  ;;  %v954_v59 = vld [vmem:[#allocation3 + $0x30] sm:$0xf] }
  0x1a   :  { %448 = vmatpush.bf16.msra.mxu3 %v1091_v38  ;;  %v1321_v60 = vld [vmem:[#allocation3 + $0x38] sm:$0xf0]  ;;  %v1050_v61 = vld [vmem:[#allocation3 + $0xf0] sm:$0xf]  ;;  %v1067_v62 = vor.u32 %v1347_v54, %v1064_v55  ;;  %v1320_v0 = vld [vmem:[#allocation3 + $0x34] sm:$0xf] }
  0x1b   :  { %407 = vmatpush.bf16.msra.mxu0 %v979_v44  ;;  %v1345_v63 = vld [vmem:[#allocation3 + $0xf8] sm:$0xf0]  ;;  %v956_v1 = vld [vmem:[#allocation3 + $0x3c] sm:$0xf0]  ;;  %v1344_v2 = vld [vmem:[#allocation3 + $0xf4] sm:$0xf]  ;;  %v955_v4 = vor.u32 %v1321_v60, %v954_v59 }
  0x1c   :  { %421 = vmatpush.bf16.msra.mxu1 %v1075_v45  ;;  %v1052_v3 = vld [vmem:[#allocation3 + $0xfc] sm:$0xf0]  ;;  %v1051_v5 = vor.u32 %v1345_v63, %v1050_v61  ;;  %v959_v6 = vor.u32 %v1320_v0, %v956_v1  ;;  %v942_v7 = vld [vmem:[#allocation3 + $0x18] sm:$0xf]  ;;  %v1318_v8 = vld [vmem:[#allocation3 + $0x20] sm:$0xf0] }
  0x1d   :  { %435 = vmatpush.bf16.msra.mxu2 %v983_v46  ;;  %v1038_v9 = vld [vmem:[#allocation3 + $0xd8] sm:$0xf]  ;;  %v1055_v10 = vor.u32 %v1344_v2, %v1052_v3  ;;  %v1342_v11 = vld [vmem:[#allocation3 + $0xe0] sm:$0xf0]  ;;  %v1317_v12 = vld [vmem:[#allocation3 + $0x1c] sm:$0xf]  ;;  %v943_v16 = vor.u32 %v1318_v8, %v942_v7 }
  0x1e   :  { %449 = vmatpush.bf16.msra.mxu3 %v1079_v50  ;;  %v944_v13 = vld [vmem:[#allocation3 + $0x24] sm:$0xf0]  ;;  %v1341_v14 = vld [vmem:[#allocation3 + $0xdc] sm:$0xf]  ;;  %v930_v17 = vld [vmem:[#allocation3] sm:$0xf]  ;;  %v1039_v19 = vor.u32 %v1342_v11, %v1038_v9 }
  0x1f   :  { %408 = vmatpush.bf16.msra.mxu0 %v967_v56  ;;  %v1040_v15 = vld [vmem:[#allocation3 + $0xe4] sm:$0xf0]  ;;  %v1315_v18 = vld [vmem:[#allocation3 + $0x8] sm:$0xf0]  ;;  %v947_v20 = vor.u32 %v1317_v12, %v944_v13  ;;  %v1026_v21 = vld [vmem:[#allocation3 + $0xc0] sm:$0xf] }
  0x20   :  { %422 = vmatpush.bf16.msra.mxu1 %v1063_v57  ;;  %v1339_v22 = vld [vmem:[#allocation3 + $0xc8] sm:$0xf0]  ;;  %v1314_v23 = vld [vmem:[#allocation3 + $0x4] sm:$0xf]  ;;  %v1043_v24 = vor.u32 %v1341_v14, %v1040_v15  ;;  %v932_v25 = vld [vmem:[#allocation3 + $0xc] sm:$0xf0]  ;;  %v931_v31 = vor.u32 %v1315_v18, %v930_v17 }
  0x21   :  { %436 = vmatpush.bf16.msra.mxu2 %v971_v58  ;;  %v1338_v26 = vld [vmem:[#allocation3 + $0xc4] sm:$0xf]  ;;  %v1028_v27 = vld [vmem:[#allocation3 + $0xcc] sm:$0xf0]  ;;  %v1337_v29 = vld [vmem:[#allocation3 + $0xb8] sm:$0xf0]  ;;  %v1027_v35 = vor.u32 %v1339_v22, %v1026_v21  ;;  %v935_v36 = vor.u32 %v1314_v23, %v932_v25 }
  0x22   :  { %450 = vmatpush.bf16.msra.mxu3 %v1067_v62  ;;  %v1022_v28 = vld [vmem:[#allocation3 + $0xb0] sm:$0xf]  ;;  %v1361_v32 = vld [vmem:[#allocation3 + $0x178] sm:$0xf0]  ;;  %v922_v33 = vld [vmem:[%s1570_s0] sm:$0xf]  ;;  %v1031_v39 = vor.u32 %v1338_v26, %v1028_v27 }
  0x23   :  { %409 = vmatpush.bf16.msra.mxu0 %v955_v4  ;;  %v1118_v30 = vld [vmem:[#allocation3 + $0x170] sm:$0xf]  ;;  %v1313_v34 = vld [vmem:[%s1570_s0 + $0x4] sm:$0xf0]  ;;  %v1312_v37 = vld [vmem:[%s1570_s0 + $0x4] sm:$0xf]  ;;  %v1023_v40 = vor.u32 %v1337_v29, %v1022_v28 }
  0x24   :  { %423 = vmatpush.bf16.msra.mxu1 %v1051_v5  ;;  %v924_v38 = vld [vmem:[%s1570_s0 + $0x8] sm:$0xf0]  ;;  %v1119_v41 = vor.u32 %v1361_v32, %v1118_v30  ;;  %v1522_v42 = vor.u32 %v1313_v34, %v922_v33  ;;  %v1010_v43 = vld [vmem:[#allocation3 + $0x98] sm:$0xf]  ;;  %v1334_v44 = vld [vmem:[#allocation3 + $0xa0] sm:$0xf0] }
  0x25   :  { %437 = vmatpush.bf16.msra.mxu2 %v959_v6  ;;  %v1524_v45 = vor.u32 %v1312_v37, %v924_v38  ;;  %v1106_v46 = vld [vmem:[#allocation3 + $0x158] sm:$0xf]  ;;  %v1358_v47 = vld [vmem:[#allocation3 + $0x160] sm:$0xf0]  ;;  %v1011_v48 = vor.u32 %v1334_v44, %v1010_v43  ;;  %v998_v49 = vld [vmem:[#allocation3 + $0x80] sm:$0xf] }
  0x26   :  { %451 = vmatpush.bf16.msra.mxu3 %v1055_v10  ;;  %v1178_v50 = vld [vmem:[#allocation5 + $0x70] sm:$0xf]  ;;  %v1377_v51 = vld [vmem:[#allocation5 + $0x74] sm:$0xf0]  ;;  %v1107_v52 = vor.u32 %v1358_v47, %v1106_v46  ;;  %v1331_v53 = vld [vmem:[#allocation3 + $0x88] sm:$0xf0] }
  0x27   :  { %410 = vmatpush.bf16.msra.mxu0 %v943_v16  ;;  %v1179_v54 = vor.u32 %v1377_v51, %v1178_v50  ;;  %v1170_v55 = vld [vmem:[#allocation5 + $0x60] sm:$0xf]  ;;  %v1375_v56 = vld [vmem:[#allocation5 + $0x64] sm:$0xf0]  ;;  %v1355_v58 = vld [vmem:[#allocation3 + $0x148] sm:$0xf0]  ;;  %v999_v62 = vor.u32 %v1331_v53, %v998_v49 }
  0x28   :  { %424 = vmatpush.bf16.msra.mxu1 %v1039_v19  ;;  %v1094_v57 = vld [vmem:[#allocation3 + $0x140] sm:$0xf]  ;;  %v1171_v59 = vor.u32 %v1375_v56, %v1170_v55  ;;  %v1242_v60 = vld [vmem:[#allocation5 + $0xf0] sm:$0xf]  ;;  %v1393_v61 = vld [vmem:[#allocation5 + $0xf4] sm:$0xf0] }
  0x29   :  { %438 = vmatpush.bf16.msra.mxu2 %v947_v20  ;;  %v986_v63 = vld [vmem:[#allocation3 + $0x68] sm:$0xf]  ;;  %v1162_v0 = vld [vmem:[#allocation5 + $0x50] sm:$0xf]  ;;  %v1373_v1 = vld [vmem:[#allocation5 + $0x54] sm:$0xf0]  ;;  %v1243_v2 = vor.u32 %v1393_v61, %v1242_v60  ;;  %v1095_v3 = vor.u32 %v1355_v58, %v1094_v57 }
  0x2a   :  { %452 = vmatpush.bf16.msra.mxu3 %v1043_v24  ;;  %v1328_v4 = vld [vmem:[#allocation3 + $0x70] sm:$0xf0]  ;;  %v1234_v5 = vld [vmem:[#allocation5 + $0xe0] sm:$0xf]  ;;  %v1391_v6 = vld [vmem:[#allocation5 + $0xe4] sm:$0xf0]  ;;  %v1163_v10 = vor.u32 %v1373_v1, %v1162_v0 }
  0x2b   :  { %411 = vmatpush.bf16.msra.mxu0 %v931_v31  ;;  %v1082_v7 = vld [vmem:[#allocation3 + $0x128] sm:$0xf]  ;;  %v1352_v8 = vld [vmem:[#allocation3 + $0x130] sm:$0xf0]  ;;  %v1235_v9 = vor.u32 %v1391_v6, %v1234_v5  ;;  %v1226_v11 = vld [vmem:[#allocation5 + $0xd0] sm:$0xf]  ;;  %v987_v13 = vor.u32 %v1328_v4, %v986_v63 }
  0x2c   :  { %425 = vmatpush.bf16.msra.mxu1 %v1027_v35  ;;  %v1389_v12 = vld [vmem:[#allocation5 + $0xd4] sm:$0xf0]  ;;  %v1154_v14 = vld [vmem:[#allocation5 + $0x40] sm:$0xf]  ;;  %v1371_v15 = vld [vmem:[#allocation5 + $0x44] sm:$0xf0]  ;;  %v1083_v16 = vor.u32 %v1352_v8, %v1082_v7 }
  0x2d   :  { %439 = vmatpush.bf16.msra.mxu2 %v935_v36  ;;  %v974_v17 = vld [vmem:[#allocation3 + $0x50] sm:$0xf]  ;;  %v1325_v18 = vld [vmem:[#allocation3 + $0x58] sm:$0xf0]  ;;  %v1227_v21 = vor.u32 %v1389_v12, %v1226_v11  ;;  %v1155_v22 = vor.u32 %v1371_v15, %v1154_v14  ;;  %v1218_v23 = vld [vmem:[#allocation5 + $0xc0] sm:$0xf] }
  0x2e   :  { %453 = vmatpush.bf16.msra.mxu3 %v1031_v39  ;;  %412 = vmatmul.bf16.vlgmr.msra.gmra.mxu0 %v1522_v42  ;;  %v1070_v19 = vld [vmem:[#allocation3 + $0x110] sm:$0xf]  ;;  %v1349_v20 = vld [vmem:[#allocation3 + $0x118] sm:$0xf0]  ;;  %v1387_v24 = vld [vmem:[#allocation5 + $0xc4] sm:$0xf0]  ;;  %v975_v25 = vor.u32 %v1325_v18, %v974_v17 }
  0x2f   :  { %460 = vmatpush.bf16.msrb.mxu0 %v1023_v40  ;;  %426 = vmatmul.bf16.vlgmr.msra.gmra.mxu1 %v1524_v45  ;;  %v1146_v26 = vld [vmem:[#allocation5 + $0x30] sm:$0xf]  ;;  %v1369_v27 = vld [vmem:[#allocation5 + $0x34] sm:$0xf0]  ;;  %v1071_v28 = vor.u32 %v1349_v20, %v1070_v19  ;;  %v1322_v30 = vld [vmem:[#allocation3 + $0x40] sm:$0xf0]  ;;  %v1219_v33 = vor.u32 %v1387_v24, %v1218_v23 }
  0x30   :  { %474 = vmatpush.bf16.msrb.mxu1 %v1119_v41  ;;  %440 = vmatmul.bf16.vlgmr.msra.gmra.mxu2 %v1522_v42  ;;  %v962_v29 = vld [vmem:[#allocation3 + $0x38] sm:$0xf]  ;;  %v1346_v32 = vld [vmem:[#allocation3 + $0x100] sm:$0xf0]  ;;  %v1147_v34 = vor.u32 %v1369_v27, %v1146_v26  ;;  %v1138_v36 = vld [vmem:[#allocation5 + $0x20] sm:$0xf] }
  0x31   :  { %454 = vmatmul.bf16.vlgmr.msra.gmra.mxu3 %v1524_v45  ;;  %820 = vmatpush.bf16.msrb.mxu2 %v1179_v54  ;;  %v1058_v31 = vld [vmem:[#allocation3 + $0xf8] sm:$0xf]  ;;  %v963_v35 = vor.u32 %v1322_v30, %v962_v29  ;;  %v1367_v37 = vld [vmem:[#allocation5 + $0x24] sm:$0xf0]  ;;  %v950_v39 = vld [vmem:[#allocation3 + $0x20] sm:$0xf] }
  0x32   :  { %834 = vmatpush.bf16.msrb.mxu3 %v1243_v2  ;;  %v1059_v38 = vor.u32 %v1346_v32, %v1058_v31  ;;  %v1319_v40 = vld [vmem:[#allocation3 + $0x28] sm:$0xf0]  ;;  %v1046_v41 = vld [vmem:[#allocation3 + $0xe0] sm:$0xf]  ;;  %v1139_v44 = vor.u32 %v1367_v37, %v1138_v36  ;;  %v1130_v47 = vld [vmem:[#allocation5 + $0x10] sm:$0xf] }
  0x33   :  { %461 = vmatpush.bf16.msrb.mxu0 %v1011_v48  ;;  %v1343_v43 = vld [vmem:[#allocation3 + $0xe8] sm:$0xf0]  ;;  %v951_v46 = vor.u32 %v1319_v40, %v950_v39  ;;  %v1365_v48 = vld [vmem:[#allocation5 + $0x14] sm:$0xf0]  ;;  %v938_v50 = vld [vmem:[#allocation3 + $0x8] sm:$0xf] }
  0x34   :  { %475 = vmatpush.bf16.msrb.mxu1 %v1107_v52  ;;  %v1047_v49 = vor.u32 %v1343_v43, %v1046_v41  ;;  %v1316_v51 = vld [vmem:[#allocation3 + $0x10] sm:$0xf0]  ;;  %v1034_v52 = vld [vmem:[#allocation3 + $0xc8] sm:$0xf]  ;;  %v1180_v55 = vld [vmem:[#allocation5 + $0x78] sm:$0xf0]  ;;  %v1131_v56 = vor.u32 %v1365_v48, %v1130_v47 }
  0x35   :  { %821 = vmatpush.bf16.msrb.mxu2 %v1171_v59  ;;  %v1340_v53 = vld [vmem:[#allocation3 + $0xd0] sm:$0xf0]  ;;  %v939_v57 = vor.u32 %v1316_v51, %v938_v50  ;;  %v1122_v58 = vld [vmem:[#allocation5] sm:$0xf]  ;;  %v1363_v59 = vld [vmem:[#allocation5 + $0x4] sm:$0xf0] }
  0x36   :  { %835 = vmatpush.bf16.msrb.mxu3 %v1235_v9  ;;  %v1376_v54 = vld [vmem:[#allocation5 + $0x74] sm:$0xf]  ;;  %v1035_v60 = vor.u32 %v1340_v53, %v1034_v52  ;;  %v1172_v63 = vld [vmem:[#allocation5 + $0x68] sm:$0xf0]  ;;  %v1123_v0 = vor.u32 %v1363_v59, %v1122_v58  ;;  %v1370_v5 = vld [vmem:[#allocation5 + $0x44] sm:$0xf] }
  0x37   :  { %462 = vmatpush.bf16.msrb.mxu0 %v999_v62  ;;  %v1183_v61 = vor.u32 %v1376_v54, %v1180_v55  ;;  %v1374_v62 = vld [vmem:[#allocation5 + $0x64] sm:$0xf]  ;;  %v1372_v2 = vld [vmem:[#allocation5 + $0x54] sm:$0xf]  ;;  %v1156_v6 = vld [vmem:[#allocation5 + $0x48] sm:$0xf0] }
  0x38   :  { %476 = vmatpush.bf16.msrb.mxu1 %v1095_v3  ;;  %v1175_v1 = vor.u32 %v1374_v62, %v1172_v63  ;;  %v1164_v3 = vld [vmem:[#allocation5 + $0x58] sm:$0xf0]  ;;  %v1159_v7 = vor.u32 %v1370_v5, %v1156_v6  ;;  %v1210_v8 = vld [vmem:[#allocation5 + $0xb0] sm:$0xf]  ;;  %v1385_v9 = vld [vmem:[#allocation5 + $0xb4] sm:$0xf0] }
  0x39   :  { %822 = vmatpush.bf16.msrb.mxu2 %v1163_v10  ;;  %v1167_v4 = vor.u32 %v1372_v2, %v1164_v3  ;;  %v1368_v10 = vld [vmem:[#allocation5 + $0x34] sm:$0xf]  ;;  %v1211_v11 = vor.u32 %v1385_v9, %v1210_v8  ;;  %v1148_v12 = vld [vmem:[#allocation5 + $0x38] sm:$0xf0]  ;;  %v1366_v18 = vld [vmem:[#allocation5 + $0x24] sm:$0xf] }
  0x3a   :  { %836 = vmatpush.bf16.msrb.mxu3 %v1227_v21  ;;  %v1244_v14 = vld [vmem:[#allocation5 + $0xf8] sm:$0xf0]  ;;  %v1140_v19 = vld [vmem:[#allocation5 + $0x28] sm:$0xf0]  ;;  %v1390_v20 = vld [vmem:[#allocation5 + $0xe4] sm:$0xf] }
  0x3b   :  { %463 = vmatpush.bf16.msrb.mxu0 %v987_v13  ;;  %v1392_v13 = vld [vmem:[#allocation5 + $0xf4] sm:$0xf]  ;;  %v1143_v21 = vor.u32 %v1366_v18, %v1140_v19  ;;  %v1194_v24 = vld [vmem:[#allocation5 + $0x90] sm:$0xf]  ;;  %v1228_v30 = vld [vmem:[#allocation5 + $0xd8] sm:$0xf0] }
  0x3c   :  { %477 = vmatpush.bf16.msrb.mxu1 %v1083_v16  ;;  %v1247_v15 = vor.u32 %v1392_v13, %v1244_v14  ;;  %v1383_v16 = vld [vmem:[#allocation5 + $0xa4] sm:$0xf0]  ;;  %v1364_v26 = vld [vmem:[#allocation5 + $0x14] sm:$0xf]  ;;  %v1124_v37 = vld [vmem:[#allocation5 + $0x8] sm:$0xf0] }
  0x3d   :  { %823 = vmatpush.bf16.msrb.mxu2 %v1155_v22  ;;  %v1236_v22 = vld [vmem:[#allocation5 + $0xe8] sm:$0xf0]  ;;  %v1388_v29 = vld [vmem:[#allocation5 + $0xd4] sm:$0xf]  ;;  %v1306_v43 = vld [vmem:[#allocation5 + $0x170] sm:$0xf] }
  0x3e   :  { %837 = vmatpush.bf16.msrb.mxu3 %v1219_v33  ;;  %v1239_v23 = vor.u32 %v1390_v20, %v1236_v22  ;;  %v1231_v32 = vor.u32 %v1388_v29, %v1228_v30  ;;  %v1186_v33 = vld [vmem:[#allocation5 + $0x80] sm:$0xf]  ;;  %v1220_v39 = vld [vmem:[#allocation5 + $0xc8] sm:$0xf0]  ;;  %v1308_v48 = vld [vmem:[#allocation5 + $0x178] sm:$0xf0] }
  0x3f   :  { %464 = vmatpush.bf16.msrb.mxu0 %v975_v25  ;;  %v1381_v25 = vld [vmem:[#allocation5 + $0x94] sm:$0xf0]  ;;  %v1384_v50 = vld [vmem:[#allocation5 + $0xb4] sm:$0xf]  ;;  %v1212_v51 = vld [vmem:[#allocation5 + $0xb8] sm:$0xf0] }
  0x40   :  { %478 = vmatpush.bf16.msrb.mxu1 %v1071_v28  ;;  %v1195_v27 = vor.u32 %v1381_v25, %v1194_v24  ;;  %v1132_v28 = vld [vmem:[#allocation5 + $0x18] sm:$0xf0]  ;;  %v1215_v52 = vor.u32 %v1384_v50, %v1212_v51  ;;  %v1298_v53 = vld [vmem:[#allocation5 + $0x160] sm:$0xf]  ;;  %v1407_v54 = vld [vmem:[#allocation5 + $0x164] sm:$0xf0] }
  0x41   :  { %824 = vmatpush.bf16.msrb.mxu2 %v1147_v34  ;;  %v1135_v31 = vor.u32 %v1364_v26, %v1132_v28  ;;  %v1379_v34 = vld [vmem:[#allocation5 + $0x84] sm:$0xf0]  ;;  %v1406_v55 = vld [vmem:[#allocation5 + $0x164] sm:$0xf]  ;;  %v1290_v62 = vld [vmem:[#allocation5 + $0x150] sm:$0xf] }
  0x42   :  { %838 = vmatpush.bf16.msrb.mxu3 %v1211_v11  ;;  %v1187_v36 = vor.u32 %v1379_v34, %v1186_v33  ;;  %v1382_v59 = vld [vmem:[#allocation5 + $0xa4] sm:$0xf]  ;;  %v1405_v63 = vld [vmem:[#allocation5 + $0x154] sm:$0xf0]  ;;  %v1292_v2 = vld [vmem:[#allocation5 + $0x158] sm:$0xf0] }
  0x43   :  { %465 = vmatpush.bf16.msrb.mxu0 %v963_v35  ;;  %v1362_v35 = vld [vmem:[#allocation5 + $0x4] sm:$0xf]  ;;  %v1196_v5 = vld [vmem:[#allocation5 + $0x98] sm:$0xf0]  ;;  %v1282_v6 = vld [vmem:[#allocation5 + $0x140] sm:$0xf] }
  0x44   :  { %479 = vmatpush.bf16.msrb.mxu1 %v1059_v38  ;;  %v1386_v38 = vld [vmem:[#allocation5 + $0xc4] sm:$0xf]  ;;  %v1127_v40 = vor.u32 %v1362_v35, %v1124_v37  ;;  %v1403_v8 = vld [vmem:[#allocation5 + $0x144] sm:$0xf0]  ;;  %v1188_v14 = vld [vmem:[#allocation5 + $0x88] sm:$0xf0] }
  0x45   :  { %825 = vmatpush.bf16.msrb.mxu2 %v1139_v44  ;;  %v1223_v41 = vor.u32 %v1386_v38, %v1220_v39  ;;  %v1409_v44 = vld [vmem:[#allocation5 + $0x174] sm:$0xf0]  ;;  %v1402_v9 = vld [vmem:[#allocation5 + $0x144] sm:$0xf]  ;;  %v1283_v11 = vor.u32 %v1403_v8, %v1282_v6  ;;  %v1276_v19 = vld [vmem:[#allocation5 + $0x138] sm:$0xf0] }
  0x46   :  { %v1307_v47 = vor.u32 %v1409_v44, %v1306_v43  ;;  %v1378_v13 = vld [vmem:[#allocation5 + $0x84] sm:$0xf]  ;;  %v1399_v24 = vld [vmem:[#allocation5 + $0x124] sm:$0xf0]  ;;  %v1268_v28 = vld [vmem:[#allocation5 + $0x128] sm:$0xf0] }
  0x47   :  { %466 = vmatpush.bf16.msrb.mxu0 %v951_v46  ;;  %v1408_v46 = vld [vmem:[#allocation5 + $0x174] sm:$0xf]  ;;  %v1397_v33 = vld [vmem:[#allocation5 + $0x114] sm:$0xf0]  ;;  %v1250_v43 = vld [vmem:[#allocation5 + $0x100] sm:$0xf] }
  0x48   :  { %480 = vmatpush.bf16.msrb.mxu1 %v1047_v49  ;;  %v1311_v49 = vor.u32 %v1408_v46, %v1308_v48  ;;  %v1396_v34 = vld [vmem:[#allocation5 + $0x114] sm:$0xf]  ;;  %v1395_v44 = vld [vmem:[#allocation5 + $0x104] sm:$0xf0]  ;;  %v1394_v46 = vld [vmem:[#allocation5 + $0x104] sm:$0xf] }
  0x49   :  { %826 = vmatpush.bf16.msrb.mxu2 %v1131_v56  ;;  %v1299_v56 = vor.u32 %v1407_v54, %v1298_v53  ;;  %v1252_v50 = vld [vmem:[#allocation5 + $0x108] sm:$0xf0] }
  0x4b   :  { %467 = vmatpush.bf16.msrb.mxu0 %v939_v57  ;;  %v1300_v57 = vld [vmem:[#allocation5 + $0x168] sm:$0xf0] }
  0x4c   :  { %481 = vmatpush.bf16.msrb.mxu1 %v1035_v60  ;;  %v1303_v58 = vor.u32 %v1406_v55, %v1300_v57  ;;  %v1204_v60 = vld [vmem:[#allocation5 + $0xa8] sm:$0xf0] }
  0x4d   :  { %827 = vmatpush.bf16.msrb.mxu2 %v1123_v0  ;;  %v1404_v0 = vld [vmem:[#allocation5 + $0x154] sm:$0xf] }
  0x4e   :  { %468 = vmatmul.bf16.vlgmr.msrb.gmra.mxu0 %v1522_v42  ;;  %v1151_v42 = vor.u32 %v1368_v10, %v1148_v12  ;;  %v1295_v3 = vor.u32 %v1404_v0, %v1292_v2  ;;  %v1284_v10 = vld [vmem:[#allocation5 + $0x148] sm:$0xf0] }
  0x4f   :  { %482 = vmatmul.bf16.vlgmr.msrb.gmra.mxu1 %v1524_v45  ;;  %v1202_v45 = vld [vmem:[#allocation5 + $0xa0] sm:$0xf]  ;;  %848 = vmatpush.bf16.msra.mxu0 %v1307_v47  ;;  %v1287_v12 = vor.u32 %v1402_v9, %v1284_v10 }
  0x50   :  { %862 = vmatpush.bf16.msra.mxu1 %v1183_v61  ;;  %v1203_v17 = vor.u32 %v1383_v16, %v1202_v45  ;;  %v1207_v61 = vor.u32 %v1382_v59, %v1204_v60  ;;  %v1401_v45 = vld [vmem:[#allocation5 + $0x134] sm:$0xf0]  ;;  %v1400_v16 = vld [vmem:[#allocation5 + $0x134] sm:$0xf] }
  0x51   :  { %876 = vmatpush.bf16.msra.mxu2 %v1247_v15  ;;  %v1274_v15 = vld [vmem:[#allocation5 + $0x130] sm:$0xf]  ;;  %v1279_v20 = vor.u32 %v1400_v16, %v1276_v19 }
  0x52   :  { %839 = vmatpush.bf16.msrb.mxu3 %v1203_v17  ;;  %v1535_v17 = vld [vmem:[%s1572_s2] sm:$0x7]  ;;  %v1275_v18 = vor.u32 %v1401_v45, %v1274_v15 }
  0x53   :  { %849 = vmatpush.bf16.msra.mxu0 %v1299_v56  ;;  %v511_v22 = vperm.slane %v1535_v17, 0  ;;  %v512_v39 = vperm.slane %v1535_v17, 1 }
  0x54   :  { %863 = vmatpush.bf16.msra.mxu1 %v1175_v1  ;;  %v1291_v1 = vor.u32 %v1405_v63, %v1290_v62  ;;  %v513_v62 = vperm.slane %v1535_v17, 2 }
  0x55   :  { %877 = vmatpush.bf16.msra.mxu2 %v1239_v23  ;;  %v1266_v23 = vld [vmem:[#allocation5 + $0x120] sm:$0xf] }
  0x56   :  { %840 = vmatpush.bf16.msrb.mxu3 %v1195_v27  ;;  %v1267_v26 = vor.u32 %v1399_v24, %v1266_v23  ;;  %v1398_v27 = vld [vmem:[#allocation5 + $0x124] sm:$0xf] }
  0x57   :  { %850 = vmatpush.bf16.msra.mxu0 %v1291_v1  ;;  %v1271_v30 = vor.u32 %v1398_v27, %v1268_v28 }
  0x58   :  { %864 = vmatpush.bf16.msra.mxu1 %v1167_v4  ;;  %v1380_v4 = vld [vmem:[#allocation5 + $0x94] sm:$0xf] }
  0x59   :  { %878 = vmatpush.bf16.msra.mxu2 %v1231_v32  ;;  %v1258_v32 = vld [vmem:[#allocation5 + $0x110] sm:$0xf] }
  0x5a   :  { %841 = vmatpush.bf16.msrb.mxu3 %v1187_v36  ;;  %v1259_v35 = vor.u32 %v1397_v33, %v1258_v32  ;;  %v1260_v36 = vld [vmem:[#allocation5 + $0x118] sm:$0xf0] }
  0x5b   :  { %851 = vmatpush.bf16.msra.mxu0 %v1283_v11  ;;  %v1263_v37 = vor.u32 %v1396_v34, %v1260_v36 }
  0x5c   :  { %865 = vmatpush.bf16.msra.mxu1 %v1159_v7  ;;  %v1199_v7 = vor.u32 %v1380_v4, %v1196_v5 }
  0x5d   :  { %879 = vmatpush.bf16.msra.mxu2 %v1223_v41 }
  0x5e   :  { %890 = vmatpush.bf16.msra.mxu3 %v1311_v49  ;;  %v1251_v49 = vor.u32 %v1395_v44, %v1250_v43 }
  0x5f   :  { %852 = vmatpush.bf16.msra.mxu0 %v1275_v18 }
  0x60   :  { %866 = vmatpush.bf16.msra.mxu1 %v1151_v42  ;;  %v1191_v42 = vor.u32 %v1378_v13, %v1188_v14 }
  0x61   :  { %880 = vmatpush.bf16.msra.mxu2 %v1215_v52  ;;  %v1255_v52 = vor.u32 %v1394_v46, %v1252_v50 }
  0x62   :  { %891 = vmatpush.bf16.msra.mxu3 %v1303_v58 }
  0x63   :  { %853 = vmatpush.bf16.msra.mxu0 %v1267_v26 }
  0x64   :  { %867 = vmatpush.bf16.msra.mxu1 %v1143_v21 }
  0x65   :  { %881 = vmatpush.bf16.msra.mxu2 %v1207_v61 }
  0x66   :  { %892 = vmatpush.bf16.msra.mxu3 %v1295_v3 }
  0x67   :  { %854 = vmatpush.bf16.msra.mxu0 %v1259_v35 }
  0x68   :  { %868 = vmatpush.bf16.msra.mxu1 %v1135_v31 }
  0x69   :  { %882 = vmatpush.bf16.msra.mxu2 %v1199_v7 }
  0x6a   :  { %893 = vmatpush.bf16.msra.mxu3 %v1287_v12 }
  0x6b   :  { %855 = vmatpush.bf16.msra.mxu0 %v1251_v49 }
  0x6c   :  { %869 = vmatpush.bf16.msra.mxu1 %v1127_v40 }
  0x6d   :  { %883 = vmatpush.bf16.msra.mxu2 %v1191_v42 }
  0x6e   :  { %894 = vmatpush.bf16.msra.mxu3 %v1279_v20 }
  0x72   :  { %895 = vmatpush.bf16.msra.mxu3 %v1271_v30 }
  0x76   :  { %896 = vmatpush.bf16.msra.mxu3 %v1263_v37 }
  0x7a   :  { %897 = vmatpush.bf16.msra.mxu3 %v1255_v52 }
  0xab   :  { %v413_v21 = vpop.f32.mrf.mxu0 }
  0xac   :  { %v427_v25 = vpop.f32.mrf.mxu1 }
  0xad   :  { %v428_v29 = vadd.f32 %v427_v25, %v413_v21 }
  0xaf   :  { %v517_v31 = vadd.f32 %v511_v22, %v428_v29 }
  0xb1   :  { %523 = vst [vmem:[%s1574_s4] sm:$0xff] %v517_v31 }
  0xb3   :  { %v441_v38 = vpop.f32.mrf.mxu2  ;;  %v415_v41 = vpop.f32.mrf.mxu0 }
  0xb4   :  { %v455_v40 = vpop.f32.mrf.mxu3  ;;  %v429_v48 = vpop.f32.mrf.mxu1 }
  0xb5   :  { %v456_v47 = vadd.f32 %v455_v40, %v441_v38  ;;  %v430_v51 = vadd.f32 %v429_v48, %v415_v41 }
  0xb7   :  { %v518_v53 = vadd.f32 %v512_v39, %v456_v47  ;;  %v520_v54 = vadd.f32 %v511_v22, %v430_v51 }
  0xb9   :  { %524 = vst [vmem:[%s1574_s4 + $0x8] sm:$0xff] %v518_v53  ;;  %v529_v55 = vpack.c.bf16 %v520_v54, %v517_v31 }
  0xba   :  { %526 = vst [vmem:[%s1574_s4 + $0x18] sm:$0xff] %v520_v54 }
  0xbb   :  { %v443_v56 = vpop.f32.mrf.mxu2  ;;  %828 = vmatmul.bf16.vlgmr.msrb.gmra.mxu2 %v529_v55  ;;  %870 = vmatmul.bf16.vlgmr.msra.gmra.mxu1 %v529_v55 }
  0xbc   :  { %v457_v57 = vpop.f32.mrf.mxu3 }
  0xbd   :  { %v458_v58 = vadd.f32 %v457_v57, %v443_v56 }
  0xbf   :  { %v521_v59 = vadd.f32 %v512_v39, %v458_v58 }
  0xc1   :  { %527 = vst [vmem:[%s1574_s4 + $0x20] sm:$0xff] %v521_v59  ;;  %v530_v60 = vpack.c.bf16 %v521_v59, %v518_v53 }
  0xc3   :  { %842 = vmatmul.bf16.vlgmr.msrb.gmra.mxu3 %v530_v60 }
  0xcb   :  { %v469_v61 = vpop.f32.mrf.mxu0  ;;  %884 = vmatmul.bf16.vlgmr.msra.gmra.mxu2 %v530_v60 }
  0xcc   :  { %v483_v63 = vpop.f32.mrf.mxu1 }
  0xcd   :  { %v484_v0 = vadd.f32 %v483_v63, %v469_v61 }
  0xcf   :  { %v519_v1 = vadd.f32 %v513_v62, %v484_v0 }
  0xd1   :  { %525 = vst [vmem:[%s1574_s4 + $0x10] sm:$0xff] %v519_v1 }
  0xd3   :  { %v471_v2 = vpop.f32.mrf.mxu0 }
  0xd4   :  { %v485_v3 = vpop.f32.mrf.mxu1 }
  0xd5   :  { %v486_v4 = vadd.f32 %v485_v3, %v471_v2 }
  0xd7   :  { %v522_v5 = vadd.f32 %v513_v62, %v486_v4 }
  0xd9   :  { %528 = vst [vmem:[%s1574_s4 + $0x28] sm:$0xff] %v522_v5  ;;  %v531_v6 = vpack.c.bf16 %v522_v5, %v519_v1 }
  0xdb   :  { %856 = vmatmul.bf16.vlgmr.msra.gmra.mxu0 %v531_v6  ;;  %898 = vmatmul.bf16.vlgmr.msra.gmra.mxu3 %v531_v6 }
 0x138   :  { %v871_v42 = vpop.f32.mrf.mxu1 }
 0x13e   :  { %v829_v7 = vpop.f32.mrf.mxu2 }
 0x140   :  { %v873_v21 = vpop.f32.mrf.mxu1 }
 0x146   :  { %v843_v8 = vpop.f32.mrf.mxu3  ;;  %v831_v9 = vpop.f32.mrf.mxu2 }
 0x147   :  { %v844_v11 = vadd.f32 %v843_v8, %v829_v7 }
 0x14e   :  { %v845_v10 = vpop.f32.mrf.mxu3  ;;  %v885_v12 = vpop.f32.mrf.mxu2 }
 0x14f   :  { %v886_v15 = vadd.f32 %v885_v12, %v871_v42  ;;  %v846_v16 = vadd.f32 %v845_v10, %v831_v9 }
 0x156   :  { %v887_v20 = vpop.f32.mrf.mxu2 }
 0x157   :  { %v888_v22 = vadd.f32 %v887_v20, %v873_v21 }
 0x158   :  { %v857_v13 = vpop.f32.mrf.mxu0 }
 0x159   :  { %v858_v14 = vadd.f32 %v857_v13, %v844_v11 }
 0x15b   :  { %904 = vst [vmem:[%s1575_s5] sm:$0xff] %v858_v14 }
 0x15e   :  { %v899_v45 = vpop.f32.mrf.mxu3 }
 0x15f   :  { %v900_v17 = vadd.f32 %v899_v45, %v886_v15 }
 0x160   :  { %v859_v18 = vpop.f32.mrf.mxu0 }
 0x161   :  { %905 = vst [vmem:[%s1575_s5 + $0x8] sm:$0xff] %v900_v17  ;;  %v860_v19 = vadd.f32 %v859_v18, %v846_v16 }
 0x163   :  { %906 = vst [vmem:[%s1575_s5 + $0x10] sm:$0xff] %v860_v19 }
 0x166   :  { %v901_v23 = vpop.f32.mrf.mxu3 }
 0x167   :  { %v902_v24 = vadd.f32 %v901_v23, %v888_v22 }
 0x169   :  { %907 = vst [vmem:[%s1575_s5 + $0x18] sm:$0xff] %v902_v24 }
 0x16a   :  { %916 = vsyncpa [#allocation4], 1 }
 0x16b   :  { %917 = vsyncpa [#allocation6], 1 }

</bundles_post_ra>
